<compile_context>
chip_gen: v7x
topology: tpu7x:2x2x1
jax: 0.10.0
libtpu: 0.0.40
codegen_flags: <defaults>
</compile_context>

<pallas_src>
import functools

import jax
import jax.numpy as jnp
import numpy as np
from jax.experimental import pallas as pl
from jax.experimental.pallas import tpu as pltpu

NEG_SLOPE = 0.2


def _leaky(x):
    return jnp.where(x > 0, x, NEG_SLOPE * x)


def _round_up(x, m):
    return (x + m - 1) // m * m


def v_std_kernel(vp_ref, e_ref, src_ids_ref, dst_ids_ref, inv_deg_ref,
                 wm0_ref, bm0_ref, wm1_ref, bm1_ref, wbc_ref, bbc_ref,
                 out_ref):
    k = pl.program_id(0)
    dot = functools.partial(jnp.dot, preferred_element_type=jnp.float32)
    bf16 = jnp.bfloat16

    tm = e_ref.shape[0]
    npad = vp_ref.shape[0]
    dn = out_ref.shape[-1]

    # --- step 0: zero the resident f32 accumulator (= the output block). ---
    @pl.when(k == 0)
    def _init():
        out_ref[...] = jnp.zeros_like(out_ref)

    # --- build the one-hot gather/scatter tiles in VMEM from indices. ---
    # Padded edges carry index -1, so their rows/columns are all zero.
    src_ids = src_ids_ref[...]                                    # [tm, 1] i32
    iota_src = jax.lax.broadcasted_iota(jnp.int32, (tm, npad), 1)
    src_oh = jnp.where(src_ids == iota_src, 1.0, 0.0).astype(bf16)  # [tm, Np]

    dst_ids = dst_ids_ref[...]                                    # [1, tm] i32
    iota_dst = jax.lax.broadcasted_iota(jnp.int32, (npad, tm), 0)
    dst_oh = jnp.where(dst_ids == iota_dst, 1.0, 0.0).astype(bf16)  # [Np, tm]

    # --- gather pooled source-node features for this edge tile (bf16 MXU). ---
    Vs = dot(src_oh, vp_ref[...])                                 # [tm, Dn] f32

    # --- GenMessage: x = MLP(E); fused scale/shift projection (bf16 MXU). ---
    # TODO(synk): MLP class definition not provided; assuming
    #             Linear -> ReLU -> Linear at edge_dim width.
    x = e_ref[...]                                                # bf16
    h = jnp.maximum(dot(x, wm0_ref[...]) + bm0_ref[...], 0.0)
    h = dot(h.astype(bf16), wm1_ref[...]) + bm1_ref[...]
    ss = dot(h.astype(bf16), wbc_ref[...]) + bbc_ref[...]         # [tm, 2*Dn]
    scale = jax.nn.sigmoid(ss[:, :dn])
    shift = ss[:, dn:]

    M1 = scale * Vs + shift
    D = M1 * M1 - M1        # M2 - M1: aggregate the difference only (1 matmul)

    # --- scatter-accumulate onto destination nodes (single bf16 matmul). ---
    out_ref[...] += dot(dst_oh, D.astype(bf16))

    # --- finalize in place: mean via inv_deg, sqrt(relu(.) + eps). ---
    @pl.when(k == pl.num_programs(0) - 1)
    def _fin():
        v_diff = out_ref[...] * inv_deg_ref[...]
        out_ref[...] = jnp.sqrt(jnp.maximum(v_diff, 0.0) + 1e-5)


def v_std_forward(V, E, src_idx, dst_idx, params, *, tile_m=512):
    N, Dn = V.shape
    M, De = E.shape
    LANE = 128

    Dnp = _round_up(Dn, LANE)
    Dep = _round_up(De, LANE)
    Np = _round_up(N, LANE)          # lane-dense iota/compare + aligned MXU dims
    tile_m = min(tile_m, _round_up(M, LANE))
    Mp = _round_up(M, tile_m)

    f32, bf16 = jnp.float32, jnp.bfloat16

    # --- NodePooling hoisted out of the kernel (used only once). ---
    Va = _leaky(V.astype(f32))
    Vp = _leaky(Va @ params['WpA'] + params['bpA'])
    Vp = Vp @ params['WpB'] + params['bpB']
    Vp_p = jnp.pad(Vp, ((0, Np - N), (0, Dnp - Dn))).astype(bf16)

    E_p = jnp.pad(E.astype(f32), ((0, Mp - M), (0, Dep - De))).astype(bf16)

    # Thin per-edge index vectors; padded edges get -1 (all-zero one-hots).
    src_col = jnp.pad(src_idx.astype(jnp.int32), (0, Mp - M),
                      constant_values=-1)[:, None]                # [Mp, 1]
    dst_row = jnp.pad(dst_idx.astype(jnp.int32), (0, Mp - M),
                      constant_values=-1)[None, :]                # [1, Mp]

    # In-degree via bincount (no dense [Np, Mp] intermediate).
    deg = jnp.bincount(dst_idx.astype(jnp.int32), length=Np).astype(f32)[:, None]
    inv_deg = jnp.where(deg > 0, 1.0 / jnp.maximum(deg, 1.0), 0.0)  # [Np, 1]

    def pad_w(w, r, c):
        return jnp.pad(w.astype(f32), ((0, r - w.shape[0]), (0, c - w.shape[1])))

    Wm0 = pad_w(params['Wm0'], Dep, Dep).astype(bf16)
    bm0 = pad_w(params['bm0'], 1, Dep)
    Wm1 = pad_w(params['Wm1'], Dep, Dep).astype(bf16)
    bm1 = pad_w(params['bm1'], 1, Dep)
    # Fuse GenMessage.B and GenMessage.C into a single [De, 2*Dn] projection.
    WBC = jnp.concatenate([pad_w(params['WB'], Dep, Dnp),
                           pad_w(params['WC'], Dep, Dnp)], axis=1).astype(bf16)
    bBC = jnp.concatenate([pad_w(params['bB'], 1, Dnp),
                           pad_w(params['bC'], 1, Dnp)], axis=1)

    def const(shape):
        return pl.BlockSpec(shape, lambda k: (0, 0))

    in_specs = [
        const((Np, Dnp)),                                  # Vp (resident, bf16)
        pl.BlockSpec((tile_m, Dep), lambda k: (k, 0)),     # E tile (bf16)
        pl.BlockSpec((tile_m, 1), lambda k: (k, 0)),       # src indices tile
        pl.BlockSpec((1, tile_m), lambda k: (0, k)),       # dst indices tile
        const((Np, 1)),                                    # inv_deg
        const((Dep, Dep)), const((1, Dep)),                # Wm0, bm0
        const((Dep, Dep)), const((1, Dep)),                # Wm1, bm1
        const((Dep, 2 * Dnp)), const((1, 2 * Dnp)),        # WBC, bBC
    ]

    out = pl.pallas_call(
        v_std_kernel,
        out_shape=jax.ShapeDtypeStruct((Np, Dnp), jnp.float32),
        grid=(Mp // tile_m,),
        in_specs=in_specs,
        out_specs=const((Np, Dnp)),                        # resident accumulator
        compiler_params=pltpu.CompilerParams(
            dimension_semantics=("arbitrary",),
            vmem_limit_bytes=64 * 1024 * 1024),
    )(Vp_p, E_p, src_col, dst_row, inv_deg, Wm0, bm0, Wm1, bm1, WBC, bBC)
    return out[:N, :Dn]


def v_std_reference(V, E, src_idx, dst_idx, params):
    """Pure-JAX f32 reference mirroring the PyTorch forward."""
    N, _ = V.shape
    V = _leaky(V)
    Vp = V @ params['WpA'] + params['bpA']
    Vp = _leaky(Vp)
    Vp = Vp @ params['WpB'] + params['bpB']

    Vs = Vp[src_idx]                                             # [M, Dn]
    x = jnp.maximum(E @ params['Wm0'] + params['bm0'], 0.0)
    x = x @ params['Wm1'] + params['bm1']
    scale = jax.nn.sigmoid(x @ params['WB'] + params['bB'])
    shift = x @ params['WC'] + params['bC']
    M1 = scale * Vs + shift
    M2 = M1 * M1

    dst_oh = jax.nn.one_hot(dst_idx, N, dtype=jnp.float32).T     # [N, M]
    deg = jnp.sum(dst_oh, axis=1, keepdims=True)
    inv_deg = jnp.where(deg > 0, 1.0 / jnp.maximum(deg, 1.0), 0.0)
    V1 = (dst_oh @ M1) * inv_deg
    V2 = (dst_oh @ M2) * inv_deg
    return jnp.sqrt(jnp.maximum(V2 - V1, 0.0) + 1e-5)


def init_params(key, node_dim, edge_dim):
    """Deterministic synthetic weights (nn.Linear stored as [in, out])."""
    def lin(k, din, dout):
        k1, k2 = jax.random.split(k)
        W = jax.random.normal(k1, (din, dout), jnp.float32) / np.sqrt(din)
        b = jax.random.normal(k2, (1, dout), jnp.float32) * 0.01
        return W, b

    ks = jax.random.split(key, 6)
    p = {}
    p['WpA'], p['bpA'] = lin(ks[0], node_dim, node_dim)   # NodePooling.A
    p['WpB'], p['bpB'] = lin(ks[1], node_dim, node_dim)   # NodePooling.B
    p['Wm0'], p['bm0'] = lin(ks[2], edge_dim, edge_dim)   # GenMessage.A layer0
    p['Wm1'], p['bm1'] = lin(ks[3], edge_dim, edge_dim)   # GenMessage.A layer1
    p['WB'],  p['bB']  = lin(ks[4], edge_dim, node_dim)   # GenMessage.B
    p['WC'],  p['bC']  = lin(ks[5], edge_dim, node_dim)   # GenMessage.C
    return p


if __name__ == "__main__":
    N, M = 8, 16            # nodes, edges
    node_dim, edge_dim = 32, 32

    key = jax.random.PRNGKey(0)
    k_v, k_e, k_s, k_d, k_p = jax.random.split(key, 5)

    V = jax.random.normal(k_v, (N, node_dim), jnp.float32)
    E = jax.random.normal(k_e, (M, edge_dim), jnp.float32)
    src_idx = jax.random.randint(k_s, (M,), 0, N)
    dst_idx = jax.random.randint(k_d, (M,), 0, N)
    params = init_params(k_p, node_dim, edge_dim)

    out = v_std_forward(V, E, src_idx, dst_idx, params)
    out = jax.block_until_ready(out)

    ref = v_std_reference(V, E, src_idx, dst_idx, params)
    assert out.shape == (N, node_dim) and out.dtype == jnp.float32

    # Numerics: the gather/scatter, edge-MLP and fused-projection matmuls run
    # in bf16 on the MXU (one-hots exact; Vp / E / weights / D rounded to
    # bf16).  sqrt(relu(x)+eps) has unbounded slope as x->0+, so a bf16-sized
    # error in x can become a sqrt(err)-sized output error near the kink.
    # Validate mainly in the monotonically-equivalent pre-sqrt domain
    # (out**2 = relu(V2-V1)+eps), where the bf16 error budget applies
    # directly, plus a coarse direct check.
    pre_k = out * out
    pre_r = ref * ref
    assert jnp.allclose(pre_k, pre_r, atol=1.5e-1, rtol=1.5e-1), (
        f"max pre-sqrt abs diff {jnp.max(jnp.abs(pre_k - pre_r))}")
    assert jnp.allclose(out, ref, atol=4e-1, rtol=1.5e-1), (
        f"max abs diff {jnp.max(jnp.abs(out - ref))}")

    print("KERNEL_OK")
</pallas_src>

<mosaic_0001>
module attributes {stable_mosaic.version = 11 : i64} {
  func.func @v_std_kernel(%arg0: i32, %arg1: memref<128x128xbf16, #tpu.memory_space<vmem>>, %arg2: memref<128x128xbf16, #tpu.memory_space<vmem>>, %arg3: memref<128x1xi32, #tpu.memory_space<vmem>>, %arg4: memref<1x128xi32, #tpu.memory_space<vmem>>, %arg5: memref<128x1xf32, #tpu.memory_space<vmem>>, %arg6: memref<128x128xbf16, #tpu.memory_space<vmem>>, %arg7: memref<1x128xf32, #tpu.memory_space<vmem>>, %arg8: memref<128x128xbf16, #tpu.memory_space<vmem>>, %arg9: memref<1x128xf32, #tpu.memory_space<vmem>>, %arg10: memref<128x256xbf16, #tpu.memory_space<vmem>>, %arg11: memref<1x256xf32, #tpu.memory_space<vmem>>, %arg12: memref<128x128xf32, #tpu.memory_space<vmem>>) attributes {dimension_semantics = [#tpu.dimension_semantics<arbitrary>], iteration_bounds = array<i64: 1>, scalar_prefetch = 0 : i64, scratch_operands = 0 : i64, tpu.core_type = #tpu.core_type<tc>, window_params = [{pipeline_mode = #tpu.pipeline_mode<synchronous>, transform_indices = @transform_0, window_bounds = array<i64: 128, 128>}, {transform_indices = @transform_1, window_bounds = array<i64: 128, 128>}, {transform_indices = @transform_2, window_bounds = array<i64: 128, 1>}, {transform_indices = @transform_3, window_bounds = array<i64: 1, 128>}, {pipeline_mode = #tpu.pipeline_mode<synchronous>, transform_indices = @transform_4, window_bounds = array<i64: 128, 1>}, {pipeline_mode = #tpu.pipeline_mode<synchronous>, transform_indices = @transform_5, window_bounds = array<i64: 128, 128>}, {pipeline_mode = #tpu.pipeline_mode<synchronous>, transform_indices = @transform_6, window_bounds = array<i64: 1, 128>}, {pipeline_mode = #tpu.pipeline_mode<synchronous>, transform_indices = @transform_7, window_bounds = array<i64: 128, 128>}, {pipeline_mode = #tpu.pipeline_mode<synchronous>, transform_indices = @transform_8, window_bounds = array<i64: 1, 128>}, {pipeline_mode = #tpu.pipeline_mode<synchronous>, transform_indices = @transform_9, window_bounds = array<i64: 128, 256>}, {pipeline_mode = #tpu.pipeline_mode<synchronous>, transform_indices = @transform_10, window_bounds = array<i64: 1, 256>}, {pipeline_mode = #tpu.pipeline_mode<synchronous>, transform_indices = @transform_11, window_bounds = array<i64: 128, 128>}]} {
    %c0_i32 = arith.constant 0 : i32
    %0 = arith.cmpi eq, %arg0, %c0_i32 : i32
    %1 = arith.extui %0 : i1 to i32
    %c0_i32_0 = arith.constant 0 : i32
    %2 = arith.cmpi ne, %1, %c0_i32_0 : i32
    scf.if %2 {
      %cst_36 = arith.constant 0.000000e+00 : f32
      %60 = vector.broadcast %cst_36 : f32 to vector<128x128xf32>
      %c0_37 = arith.constant 0 : index
      %c0_38 = arith.constant 0 : index
      %61 = vector.load %arg12[%c0_37, %c0_38] : memref<128x128xf32, #tpu.memory_space<vmem>>, vector<128x128xf32>
      tpu.vector_store %arg12[%c0_37, %c0_38], %60 {strides = array<i32>} : memref<128x128xf32, #tpu.memory_space<vmem>>, vector<128x128xf32>,
    } else {
    }
    %c0 = arith.constant 0 : index
    %c0_1 = arith.constant 0 : index
    %3 = vector.load %arg3[%c0, %c0_1] : memref<128x1xi32, #tpu.memory_space<vmem>>, vector<128x1xi32>
    %4 = tpu.iota {dimensions = array<i32: 1>} : vector<128x128xi32>
    %5 = vector.broadcast %3 : vector<128x1xi32> to vector<128x128xi32>
    %6 = arith.cmpi eq, %5, %4 : vector<128x128xi32>
    %cst = arith.constant 1.000000e+00 : f32
    %cst_2 = arith.constant 0.000000e+00 : f32
    %7 = vector.broadcast %cst : f32 to vector<128x128xf32>
    %8 = vector.broadcast %cst_2 : f32 to vector<128x128xf32>
    %9 = arith.select %6, %7, %8 : vector<128x128xi1>, vector<128x128xf32>
    %10 = arith.truncf %9 : vector<128x128xf32> to vector<128x128xbf16>
    %c0_3 = arith.constant 0 : index
    %c0_4 = arith.constant 0 : index
    %11 = vector.load %arg4[%c0_3, %c0_4] : memref<1x128xi32, #tpu.memory_space<vmem>>, vector<1x128xi32>
    %12 = tpu.iota {dimensions = array<i32: 0>} : vector<128x128xi32>
    %13 = vector.broadcast %11 : vector<1x128xi32> to vector<128x128xi32>
    %14 = arith.cmpi eq, %13, %12 : vector<128x128xi32>
    %cst_5 = arith.constant 1.000000e+00 : f32
    %cst_6 = arith.constant 0.000000e+00 : f32
    %15 = vector.broadcast %cst_5 : f32 to vector<128x128xf32>
    %16 = vector.broadcast %cst_6 : f32 to vector<128x128xf32>
    %17 = arith.select %14, %15, %16 : vector<128x128xi1>, vector<128x128xf32>
    %18 = arith.truncf %17 : vector<128x128xf32> to vector<128x128xbf16>
    %c0_7 = arith.constant 0 : index
    %c0_8 = arith.constant 0 : index
    %19 = vector.load %arg1[%c0_7, %c0_8] : memref<128x128xbf16, #tpu.memory_space<vmem>>, vector<128x128xbf16>
    %cst_9 = arith.constant dense<0.000000e+00> : vector<128x128xf32>
    %20 = tpu.matmul %10, %19, %cst_9 {dimension_numbers = #tpu.dot_dimension_numbers<[1], [0], [0], [1], [0, 0, 1, 1], [], []>} : vector<128x128xbf16>, vector<128x128xbf16>, vector<128x128xf32> -> vector<128x128xf32>
    %c0_10 = arith.constant 0 : index
    %c0_11 = arith.constant 0 : index
    %21 = vector.load %arg2[%c0_10, %c0_11] : memref<128x128xbf16, #tpu.memory_space<vmem>>, vector<128x128xbf16>
    %c0_12 = arith.constant 0 : index
    %c0_13 = arith.constant 0 : index
    %22 = vector.load %arg6[%c0_12, %c0_13] : memref<128x128xbf16, #tpu.memory_space<vmem>>, vector<128x128xbf16>
    %cst_14 = arith.constant dense<0.000000e+00> : vector<128x128xf32>
    %23 = tpu.matmul %21, %22, %cst_14 {dimension_numbers = #tpu.dot_dimension_numbers<[1], [0], [0], [1], [0, 0, 1, 1], [], []>} : vector<128x128xbf16>, vector<128x128xbf16>, vector<128x128xf32> -> vector<128x128xf32>
    %c0_15 = arith.constant 0 : index
    %c0_16 = arith.constant 0 : index
    %24 = vector.load %arg7[%c0_15, %c0_16] : memref<1x128xf32, #tpu.memory_space<vmem>>, vector<1x128xf32>
    %25 = vector.broadcast %24 : vector<1x128xf32> to vector<128x128xf32>
    %26 = arith.addf %23, %25 : vector<128x128xf32>
    %cst_17 = arith.constant 0.000000e+00 : f32
    %27 = vector.broadcast %cst_17 : f32 to vector<128x128xf32>
    %28 = arith.maximumf %26, %27 : vector<128x128xf32>
    %29 = arith.truncf %28 : vector<128x128xf32> to vector<128x128xbf16>
    %c0_18 = arith.constant 0 : index
    %c0_19 = arith.constant 0 : index
    %30 = vector.load %arg8[%c0_18, %c0_19] : memref<128x128xbf16, #tpu.memory_space<vmem>>, vector<128x128xbf16>
    %cst_20 = arith.constant dense<0.000000e+00> : vector<128x128xf32>
    %31 = tpu.matmul %29, %30, %cst_20 {dimension_numbers = #tpu.dot_dimension_numbers<[1], [0], [0], [1], [0, 0, 1, 1], [], []>} : vector<128x128xbf16>, vector<128x128xbf16>, vector<128x128xf32> -> vector<128x128xf32>
    %c0_21 = arith.constant 0 : index
    %c0_22 = arith.constant 0 : index
    %32 = vector.load %arg9[%c0_21, %c0_22] : memref<1x128xf32, #tpu.memory_space<vmem>>, vector<1x128xf32>
    %33 = vector.broadcast %32 : vector<1x128xf32> to vector<128x128xf32>
    %34 = arith.addf %31, %33 : vector<128x128xf32>
    %35 = arith.truncf %34 : vector<128x128xf32> to vector<128x128xbf16>
    %c0_23 = arith.constant 0 : index
    %c0_24 = arith.constant 0 : index
    %36 = vector.load %arg10[%c0_23, %c0_24] : memref<128x256xbf16, #tpu.memory_space<vmem>>, vector<128x256xbf16>
    %cst_25 = arith.constant dense<0.000000e+00> : vector<128x256xf32>
    %37 = tpu.matmul %35, %36, %cst_25 {dimension_numbers = #tpu.dot_dimension_numbers<[1], [0], [0], [1], [0, 0, 1, 1], [], []>} : vector<128x128xbf16>, vector<128x256xbf16>, vector<128x256xf32> -> vector<128x256xf32>
    %c0_26 = arith.constant 0 : index
    %c0_27 = arith.constant 0 : index
    %38 = vector.load %arg11[%c0_26, %c0_27] : memref<1x256xf32, #tpu.memory_space<vmem>>, vector<1x256xf32>
    %39 = vector.broadcast %38 : vector<1x256xf32> to vector<128x256xf32>
    %40 = arith.addf %37, %39 : vector<128x256xf32>
    %41 = vector.extract_strided_slice %40 {offsets = [0, 0], sizes = [128, 128], strides = [1, 1]} : vector<128x256xf32> to vector<128x128xf32>
    %42 = arith.negf %41 : vector<128x128xf32>
    %43 = math.exp %42 : vector<128x128xf32>
    %cst_28 = arith.constant 1.000000e+00 : f32
    %44 = vector.broadcast %cst_28 : f32 to vector<128x128xf32>
    %45 = arith.addf %44, %43 : vector<128x128xf32>
    %46 = arith.divf %44, %45 : vector<128x128xf32>
    %47 = vector.extract_strided_slice %40 {offsets = [0, 128], sizes = [128, 128], strides = [1, 1]} : vector<128x256xf32> to vector<128x128xf32>
    %48 = arith.mulf %46, %20 : vector<128x128xf32>
    %49 = arith.addf %48, %47 : vector<128x128xf32>
    %50 = arith.mulf %49, %49 : vector<128x128xf32>
    %51 = arith.subf %50, %49 : vector<128x128xf32>
    %c0_29 = arith.constant 0 : index
    %c0_30 = arith.constant 0 : index
    %52 = vector.load %arg12[%c0_29, %c0_30] : memref<128x128xf32, #tpu.memory_space<vmem>>, vector<128x128xf32>
    %53 = arith.truncf %51 : vector<128x128xf32> to vector<128x128xbf16>
    %cst_31 = arith.constant dense<0.000000e+00> : vector<128x128xf32>
    %54 = tpu.matmul %18, %53, %cst_31 {dimension_numbers = #tpu.dot_dimension_numbers<[1], [0], [0], [1], [0, 0, 1, 1], [], []>} : vector<128x128xbf16>, vector<128x128xbf16>, vector<128x128xf32> -> vector<128x128xf32>
    %55 = arith.addf %52, %54 : vector<128x128xf32>
    %c0_32 = arith.constant 0 : index
    %c0_33 = arith.constant 0 : index
    %56 = vector.load %arg12[%c0_32, %c0_33] : memref<128x128xf32, #tpu.memory_space<vmem>>, vector<128x128xf32>
    tpu.vector_store %arg12[%c0_32, %c0_33], %55 {strides = array<i32>} : memref<128x128xf32, #tpu.memory_space<vmem>>, vector<128x128xf32>,
    %c0_i32_34 = arith.constant 0 : i32
    %57 = arith.cmpi eq, %arg0, %c0_i32_34 : i32
    %58 = arith.extui %57 : i1 to i32
    %c0_i32_35 = arith.constant 0 : i32
    %59 = arith.cmpi ne, %58, %c0_i32_35 : i32
    scf.if %59 {
      %c0_36 = arith.constant 0 : index
      %c0_37 = arith.constant 0 : index
      %60 = vector.load %arg12[%c0_36, %c0_37] : memref<128x128xf32, #tpu.memory_space<vmem>>, vector<128x128xf32>
      %c0_38 = arith.constant 0 : index
      %c0_39 = arith.constant 0 : index
      %61 = vector.load %arg5[%c0_38, %c0_39] : memref<128x1xf32, #tpu.memory_space<vmem>>, vector<128x1xf32>
      %62 = vector.broadcast %61 : vector<128x1xf32> to vector<128x128xf32>
      %63 = arith.mulf %60, %62 : vector<128x128xf32>
      %cst_40 = arith.constant 0.000000e+00 : f32
      %64 = vector.broadcast %cst_40 : f32 to vector<128x128xf32>
      %65 = arith.maximumf %63, %64 : vector<128x128xf32>
      %cst_41 = arith.constant 9.99999974E-6 : f32
      %66 = vector.broadcast %cst_41 : f32 to vector<128x128xf32>
      %67 = arith.addf %65, %66 : vector<128x128xf32>
      %68 = math.sqrt %67 : vector<128x128xf32>
      %c0_42 = arith.constant 0 : index
      %c0_43 = arith.constant 0 : index
      %69 = vector.load %arg12[%c0_42, %c0_43] : memref<128x128xf32, #tpu.memory_space<vmem>>, vector<128x128xf32>
      tpu.vector_store %arg12[%c0_42, %c0_43], %68 {strides = array<i32>} : memref<128x128xf32, #tpu.memory_space<vmem>>, vector<128x128xf32>,
    } else {
    }
    return
  }
  func.func @transform_0(%arg0: i32) -> (i32, i32) {
    %c0_i32 = arith.constant 0 : i32
    %c0_i32_0 = arith.constant 0 : i32
    %c0_i32_1 = arith.constant 0 : i32
    return %c0_i32, %c0_i32_0 : i32, i32
  }
  func.func @transform_1(%arg0: i32) -> (i32, i32) {
    %c0_i32 = arith.constant 0 : i32
    %c0_i32_0 = arith.constant 0 : i32
    return %arg0, %c0_i32 : i32, i32
  }
  func.func @transform_2(%arg0: i32) -> (i32, i32) {
    %c0_i32 = arith.constant 0 : i32
    %c0_i32_0 = arith.constant 0 : i32
    return %arg0, %c0_i32 : i32, i32
  }
  func.func @transform_3(%arg0: i32) -> (i32, i32) {
    %c0_i32 = arith.constant 0 : i32
    %c0_i32_0 = arith.constant 0 : i32
    return %c0_i32, %arg0 : i32, i32
  }
  func.func @transform_4(%arg0: i32) -> (i32, i32) {
    %c0_i32 = arith.constant 0 : i32
    %c0_i32_0 = arith.constant 0 : i32
    %c0_i32_1 = arith.constant 0 : i32
    return %c0_i32, %c0_i32_0 : i32, i32
  }
  func.func @transform_5(%arg0: i32) -> (i32, i32) {
    %c0_i32 = arith.constant 0 : i32
    %c0_i32_0 = arith.constant 0 : i32
    %c0_i32_1 = arith.constant 0 : i32
    return %c0_i32, %c0_i32_0 : i32, i32
  }
  func.func @transform_6(%arg0: i32) -> (i32, i32) {
    %c0_i32 = arith.constant 0 : i32
    %c0_i32_0 = arith.constant 0 : i32
    %c0_i32_1 = arith.constant 0 : i32
    return %c0_i32, %c0_i32_0 : i32, i32
  }
  func.func @transform_7(%arg0: i32) -> (i32, i32) {
    %c0_i32 = arith.constant 0 : i32
    %c0_i32_0 = arith.constant 0 : i32
    %c0_i32_1 = arith.constant 0 : i32
    return %c0_i32, %c0_i32_0 : i32, i32
  }
  func.func @transform_8(%arg0: i32) -> (i32, i32) {
    %c0_i32 = arith.constant 0 : i32
    %c0_i32_0 = arith.constant 0 : i32
    %c0_i32_1 = arith.constant 0 : i32
    return %c0_i32, %c0_i32_0 : i32, i32
  }
  func.func @transform_9(%arg0: i32) -> (i32, i32) {
    %c0_i32 = arith.constant 0 : i32
    %c0_i32_0 = arith.constant 0 : i32
    %c0_i32_1 = arith.constant 0 : i32
    return %c0_i32, %c0_i32_0 : i32, i32
  }
  func.func @transform_10(%arg0: i32) -> (i32, i32) {
    %c0_i32 = arith.constant 0 : i32
    %c0_i32_0 = arith.constant 0 : i32
    %c0_i32_1 = arith.constant 0 : i32
    return %c0_i32, %c0_i32_0 : i32, i32
  }
  func.func @transform_11(%arg0: i32) -> (i32, i32) {
    %c0_i32 = arith.constant 0 : i32
    %c0_i32_0 = arith.constant 0 : i32
    %c0_i32_1 = arith.constant 0 : i32
    return %c0_i32, %c0_i32_0 : i32, i32
  }
}

</mosaic_0001>

<bundles_post_ra>
// kernel: tpu_custom_call.1
= control target key start
LH: loop header
LB: loop body
LE: loop exit
PB: predicated region body
PF: predicated region fallthrough
CT: control target
= control target key end

     0   :  { %16 = vsyncpa [#allocation3], 0  ;;  %s3150_s0 = inlined_call_operand.hbm [shape: bf16[128,128], index: 0, kind: input, shape index: {}]   ;;  %s3151_s1 = inlined_call_operand.hbm [shape: bf16[128,128], index: 1, kind: input, shape index: {}]   ;;  %s3152_s2 = inlined_call_operand.hbm [shape: s32[128,1], index: 2, kind: input, shape index: {}]   ;;  %s3153_s3 = inlined_call_operand.hbm [shape: s32[1,128], index: 3, kind: input, shape index: {}]   ;;  %s3154_s4 = inlined_call_operand.hbm [shape: f32[128,1], index: 4, kind: input, shape index: {}]   ;;  %s3155_s5 = inlined_call_operand.hbm [shape: bf16[128,128], index: 5, kind: input, shape index: {}]   ;;  %s3156_s6 = inlined_call_operand.hbm [shape: f32[1,128], index: 6, kind: input, shape index: {}]   ;;  %s3157_s7 = inlined_call_operand.hbm [shape: bf16[128,128], index: 7, kind: input, shape index: {}]   ;;  %s3158_s8 = inlined_call_operand.hbm [shape: f32[1,128], index: 8, kind: input, shape index: {}]   ;;  %s3159_s9 = inlined_call_operand.hbm [shape: bf16[128,256], index: 9, kind: input, shape index: {}]   ;;  %s3160_s10 = inlined_call_operand.hbm [shape: f32[1,256], index: 10, kind: input, shape index: {}]   ;;  %s3161_s11 = inlined_call_operand.hbm [shape: f32[128,128], index: 11, kind: output, shape index: {}]  }
   0x1   :  { %17 = vsyncpa [#allocation6], 0 }
   0x2   :  { %18 = vsyncpa [#allocation9], 0 }
   0x3   :  { %19 = vsyncpa [#allocation12], 0 }
   0x4   :  { %20 = vsyncpa [#allocation15], 0 }
   0x5   :  { %21 = vsyncpa [#allocation18], 0 }
   0x6   :  { %22 = vsyncpa [#allocation4], 0  ;;  %s2551_s17 = smov [#allocation5]   ;;  %s2552_s19 = smov [#allocation8]  }
   0x7   :  { %s40_s18 = sshll.u32 %s2551_s17, 4  ;;  %s65_s20 = sshll.u32 %s2552_s19, 4  ;;  %s41_s18 = int_to_ptr.vmem [resolvable:$true] %s40_s18  ;;  %s2629_s20 = int_to_ptr.vmem [resolvable:$true] %s65_s20 }
   0x8   :  { %s2273_s23 = scalar_lea.hbm %s3151_s1, 1024 }
   0x9   :  { %p2274_p0 = scmp.ne.s32.totalorder %s3151_s1, %s2273_s23  ;;  %p2277_p1 = scmp.lt.u32.totalorder %s2273_s23, %s3151_s1 }
   0xb   :  { %p2279_p2 = pnand %p2277_p1, %p2274_p0 }
   0xd   :  { %2282 = shalt.err (!%p2279_p2)
}
   0xe   :  { %s2283_s28 = scalar_lea.vmem %s41_s18, 1024  ;;  %p2288_p4 = scmp.lt.s32.totalorder %s41_s18, %s41_s18 }
   0xf   :  { %p2284_p3 = scmp.ne.s32.totalorder %s41_s18, %s2283_s28  ;;  %p2289_p5 = scmp.lt.s32.totalorder %s2283_s28, %s2283_s28 }
  0x11   :  { %p2290_p6 = por %p2289_p5, %p2288_p4 }
  0x13   :  { %p2291_p7 = pnand %p2290_p6, %p2284_p3 }
  0x15   :  { %2294 = shalt.err (!%p2291_p7)
}
  0x16   :  { %s2553_s29 = smov 64   ;;  %s2554_s30 = smov 4  }
  0x17   :  { %46 = dma.hbm_to_vmem [thread:$0]  %s3151_s1, 1024, %s41_s18, [#allocation6], %s2553_s29, %s2553_s29, %s2554_s30  }
  0x18   :  { %s2295_s16 = scalar_lea.hbm %s3153_s3, 16 }
  0x19   :  { %p2296_p8 = scmp.ne.s32.totalorder %s3153_s3, %s2295_s16  ;;  %p2299_p9 = scmp.lt.u32.totalorder %s2295_s16, %s3153_s3 }
  0x1b   :  { %p2301_p10 = pnand %p2299_p9, %p2296_p8 }
  0x1d   :  { %2304 = shalt.err (!%p2301_p10)
}
  0x1e   :  { %s2305_s23 = scalar_lea.vmem %s2629_s20, 16  ;;  %s2309_s1 = scalar_lea.vmem %s2629_s20, 32 }
  0x1f   :  { %p2306_p11 = scmp.ne.s32.totalorder %s2629_s20, %s2305_s23  ;;  %p2310_p12 = scmp.lt.s32.totalorder %s2629_s20, %s2629_s20 }
  0x20   :  { %p2311_p13 = scmp.lt.s32.totalorder %s2309_s1, %s2305_s23 }
  0x22   :  { %p2312_p0 = por %p2311_p13, %p2310_p12 }
  0x24   :  { %p2313_p1 = pnand %p2312_p0, %p2306_p11 }
  0x26   :  { %2316 = shalt.err (!%p2313_p1)
}
  0x27   :  { %68 = dma.hbm_to_vmem [thread:$0]  %s3153_s3, 16, %s2629_s20, [#allocation9]  }
  0x28   :  { %s2555_s25 = smov [#allocation11]   ;;  %s2556_s27 = smov [#allocation14]  }
  0x29   :  { %s86_s26 = sshll.u32 %s2555_s25, 4  ;;  %s108_s28 = sshll.u32 %s2556_s27, 4  ;;  %s87_s26 = int_to_ptr.vmem [resolvable:$true] %s86_s26  ;;  %s2664_s28 = int_to_ptr.vmem [resolvable:$true] %s108_s28 }
  0x2a   :  { %s2317_s14 = scalar_lea.hbm %s3155_s5, 1024 }
  0x2b   :  { %p2318_p2 = scmp.ne.s32.totalorder %s3155_s5, %s2317_s14  ;;  %p2321_p3 = scmp.lt.u32.totalorder %s2317_s14, %s3155_s5 }
  0x2d   :  { %p2323_p4 = pnand %p2321_p3, %p2318_p2 }
  0x2f   :  { %2326 = shalt.err (!%p2323_p4)
}
  0x30   :  { %s2327_s3 = scalar_lea.vmem %s87_s26, 1024  ;;  %p2332_p6 = scmp.lt.s32.totalorder %s87_s26, %s87_s26 }
  0x31   :  { %p2328_p5 = scmp.ne.s32.totalorder %s87_s26, %s2327_s3  ;;  %p2333_p7 = scmp.lt.s32.totalorder %s2327_s3, %s2327_s3 }
  0x33   :  { %p2334_p8 = por %p2333_p7, %p2332_p6 }
  0x35   :  { %p2335_p9 = pnand %p2334_p8, %p2328_p5 }
  0x37   :  { %2338 = shalt.err (!%p2335_p9)
}
  0x38   :  { %92 = dma.hbm_to_vmem [thread:$0]  %s3155_s5, 1024, %s87_s26, [#allocation12], %s2553_s29, %s2553_s29, %s2554_s30  }
  0x39   :  { %s2339_s1 = scalar_lea.hbm %s3157_s7, 1024 }
  0x3a   :  { %p2340_p10 = scmp.ne.s32.totalorder %s3157_s7, %s2339_s1  ;;  %p2343_p11 = scmp.lt.u32.totalorder %s2339_s1, %s3157_s7 }
  0x3c   :  { %p2345_p12 = pnand %p2343_p11, %p2340_p10 }
  0x3e   :  { %2348 = shalt.err (!%p2345_p12)
}
  0x3f   :  { %s2349_s12 = scalar_lea.vmem %s2664_s28, 1024  ;;  %p2354_p0 = scmp.lt.s32.totalorder %s2664_s28, %s2664_s28 }
  0x40   :  { %p2350_p13 = scmp.ne.s32.totalorder %s2664_s28, %s2349_s12  ;;  %p2355_p1 = scmp.lt.s32.totalorder %s2349_s12, %s2349_s12 }
  0x42   :  { %p2356_p2 = por %p2355_p1, %p2354_p0 }
  0x44   :  { %p2357_p3 = pnand %p2356_p2, %p2350_p13 }
  0x46   :  { %2360 = shalt.err (!%p2357_p3)
}
  0x47   :  { %114 = dma.hbm_to_vmem [thread:$0]  %s3157_s7, 1024, %s2664_s28, [#allocation15], %s2553_s29, %s2553_s29, %s2554_s30  }
  0x48   :  { %s2557_s13 = smov [#allocation17]   ;;  %s2558_s15 = smov [#allocation2]  }
  0x49   :  { %s130_s14 = sshll.u32 %s2557_s13, 4  ;;  %s28_s16 = sshll.u32 %s2558_s15, 4  ;;  %s131_s14 = int_to_ptr.vmem [resolvable:$true] %s130_s14  ;;  %s2701_s16 = int_to_ptr.vmem [resolvable:$true] %s28_s16 }
  0x4a   :  { %s2361_s3 = scalar_lea.hbm %s3159_s9, 2048 }
  0x4b   :  { %p2362_p4 = scmp.ne.s32.totalorder %s3159_s9, %s2361_s3  ;;  %p2365_p5 = scmp.lt.u32.totalorder %s2361_s3, %s3159_s9 }
  0x4d   :  { %p2367_p6 = pnand %p2365_p5, %p2362_p4 }
  0x4f   :  { %2370 = shalt.err (!%p2367_p6)
}
  0x50   :  { %s2371_s7 = scalar_lea.vmem %s131_s14, 2048  ;;  %p2376_p8 = scmp.lt.s32.totalorder %s131_s14, %s131_s14 }
  0x51   :  { %p2372_p7 = scmp.ne.s32.totalorder %s131_s14, %s2371_s7  ;;  %p2377_p9 = scmp.lt.s32.totalorder %s2371_s7, %s2371_s7 }
  0x53   :  { %p2378_p10 = por %p2377_p9, %p2376_p8 }
  0x55   :  { %p2379_p11 = pnand %p2378_p10, %p2372_p7 }
  0x57   :  { %2382 = shalt.err (!%p2379_p11)
}
  0x58   :  { %s2559_s28 = smov 128   ;;  %s2560_s1 = smov 8  }
  0x59   :  { %136 = dma.hbm_to_vmem [thread:$0]  %s3159_s9, 2048, %s131_s14, [#allocation18], %s2559_s28, %s2559_s28, %s2560_s1  }
  0x5a   :  { %s2383_s12 = scalar_lea.hbm %s3150_s0, 1024 }
  0x5b   :  { %p2384_p12 = scmp.ne.s32.totalorder %s3150_s0, %s2383_s12  ;;  %p2387_p13 = scmp.lt.u32.totalorder %s2383_s12, %s3150_s0 }
  0x5d   :  { %p2389_p0 = pnand %p2387_p13, %p2384_p12 }
  0x5f   :  { %2392 = shalt.err (!%p2389_p0)
}
  0x60   :  { %s2393_s17 = scalar_lea.vmem %s2701_s16, 1024  ;;  %p2398_p2 = scmp.lt.s32.totalorder %s2701_s16, %s2701_s16 }
  0x61   :  { %p2394_p1 = scmp.ne.s32.totalorder %s2701_s16, %s2393_s17  ;;  %p2399_p3 = scmp.lt.s32.totalorder %s2393_s17, %s2393_s17 }
  0x63   :  { %p2400_p4 = por %p2399_p3, %p2398_p2 }
  0x65   :  { %p2401_p5 = pnand %p2400_p4, %p2394_p1 }
  0x67   :  { %2404 = shalt.err (!%p2401_p5)
}
  0x68   :  { %34 = dma.hbm_to_vmem [thread:$0]  %s3150_s0, 1024, %s2701_s16, [#allocation3], %s2553_s29, %s2553_s29, %s2554_s30  }
  0x69   :  { %s2561_s19 = smov [#allocation7]   ;;  %s2562_s20 = smov [#allocation10]  }
  0x6a   :  { %s52_s3 = sshll.u32 %s2561_s19, 4  ;;  %s74_s21 = sshll.u32 %s2562_s20, 4  ;;  %s53_s3 = int_to_ptr.vmem [resolvable:$true] %s52_s3  ;;  %s2738_s21 = int_to_ptr.vmem [resolvable:$true] %s74_s21 }
  0x6b   :  { %s2405_s7 = scalar_lea.hbm %s3152_s2, 2048 }
  0x6c   :  { %p2406_p6 = scmp.ne.s32.totalorder %s3152_s2, %s2405_s7  ;;  %p2409_p7 = scmp.lt.u32.totalorder %s2405_s7, %s3152_s2 }
  0x6e   :  { %p2411_p8 = pnand %p2409_p7, %p2406_p6 }
  0x70   :  { %2414 = shalt.err (!%p2411_p8)
}
  0x71   :  { %s2415_s0 = scalar_lea.vmem %s53_s3, 2048  ;;  %p2420_p10 = scmp.lt.s32.totalorder %s53_s3, %s53_s3 }
  0x72   :  { %p2416_p9 = scmp.ne.s32.totalorder %s53_s3, %s2415_s0  ;;  %p2421_p11 = scmp.lt.s32.totalorder %s2415_s0, %s2415_s0 }
  0x74   :  { %p2422_p12 = por %p2421_p11, %p2420_p10 }
  0x76   :  { %p2423_p13 = pnand %p2422_p12, %p2416_p9 }
  0x78   :  { %2426 = shalt.err (!%p2423_p13)
}
  0x79   :  { %58 = dma.hbm_to_vmem [thread:$0]  %s3152_s2, 2048, %s53_s3, [#allocation6], %s2559_s28, %s2559_s28, %s2560_s1  }
  0x7a   :  { %s2427_s5 = scalar_lea.hbm %s3154_s4, 2048 }
  0x7b   :  { %p2428_p0 = scmp.ne.s32.totalorder %s3154_s4, %s2427_s5  ;;  %p2431_p1 = scmp.lt.u32.totalorder %s2427_s5, %s3154_s4 }
  0x7d   :  { %p2433_p2 = pnand %p2431_p1, %p2428_p0 }
  0x7f   :  { %2436 = shalt.err (!%p2433_p2)
}
  0x80   :  { %s2437_s9 = scalar_lea.vmem %s2738_s21, 2048  ;;  %p2442_p4 = scmp.lt.s32.totalorder %s2738_s21, %s2738_s21 }
  0x81   :  { %p2438_p3 = scmp.ne.s32.totalorder %s2738_s21, %s2437_s9  ;;  %p2443_p5 = scmp.lt.s32.totalorder %s2437_s9, %s2437_s9 }
  0x83   :  { %p2444_p6 = por %p2443_p5, %p2442_p4 }
  0x85   :  { %p2445_p7 = pnand %p2444_p6, %p2438_p3 }
  0x87   :  { %2448 = shalt.err (!%p2445_p7)
}
  0x88   :  { %80 = dma.hbm_to_vmem [thread:$0]  %s3154_s4, 2048, %s2738_s21, [#allocation9], %s2559_s28, %s2559_s28, %s2560_s1  }
  0x89   :  { %s2563_s19 = smov [#allocation13]   ;;  %s2564_s20 = smov [#allocation16]  }
  0x8a   :  { %s99_s3 = sshll.u32 %s2563_s19, 4  ;;  %s121_s22 = sshll.u32 %s2564_s20, 4  ;;  %s100_s3 = int_to_ptr.vmem [resolvable:$true] %s99_s3  ;;  %s122_s22 = int_to_ptr.vmem [resolvable:$true] %s121_s22 }
  0x8b   :  { %s2449_s18 = scalar_lea.hbm %s3156_s6, 16 }
  0x8c   :  { %p2450_p8 = scmp.ne.s32.totalorder %s3156_s6, %s2449_s18  ;;  %p2453_p9 = scmp.lt.u32.totalorder %s2449_s18, %s3156_s6 }
  0x8e   :  { %p2455_p10 = pnand %p2453_p9, %p2450_p8 }
  0x90   :  { %2458 = shalt.err (!%p2455_p10)
}
  0x91   :  { %s2459_s4 = scalar_lea.vmem %s100_s3, 16  ;;  %s2463_s21 = scalar_lea.vmem %s100_s3, 32 }
  0x92   :  { %p2460_p11 = scmp.ne.s32.totalorder %s100_s3, %s2459_s4  ;;  %p2464_p12 = scmp.lt.s32.totalorder %s100_s3, %s100_s3 }
  0x93   :  { %p2465_p13 = scmp.lt.s32.totalorder %s2463_s21, %s2459_s4 }
  0x95   :  { %p2466_p0 = por %p2465_p13, %p2464_p12 }
  0x97   :  { %p2467_p1 = pnand %p2466_p0, %p2460_p11 }
  0x99   :  { %2470 = shalt.err (!%p2467_p1)
}
  0x9a   :  { %102 = dma.hbm_to_vmem [thread:$0]  %s3156_s6, 16, %s100_s3, [#allocation12]  }
  0x9b   :  { %s2471_s5 = scalar_lea.hbm %s3158_s8, 16 }
  0x9c   :  { %p2472_p2 = scmp.ne.s32.totalorder %s3158_s8, %s2471_s5  ;;  %p2475_p3 = scmp.lt.u32.totalorder %s2471_s5, %s3158_s8 }
  0x9e   :  { %p2477_p4 = pnand %p2475_p3, %p2472_p2 }
  0xa0   :  { %2480 = shalt.err (!%p2477_p4)
}
  0xa1   :  { %s2481_s9 = scalar_lea.vmem %s122_s22, 16  ;;  %s2485_s2 = scalar_lea.vmem %s122_s22, 32 }
  0xa2   :  { %p2482_p5 = scmp.ne.s32.totalorder %s122_s22, %s2481_s9  ;;  %p2486_p6 = scmp.lt.s32.totalorder %s122_s22, %s122_s22 }
  0xa3   :  { %p2487_p7 = scmp.lt.s32.totalorder %s2485_s2, %s2481_s9 }
  0xa5   :  { %p2488_p8 = por %p2487_p7, %p2486_p6 }
  0xa7   :  { %p2489_p9 = pnand %p2488_p8, %p2482_p5 }
  0xa9   :  { %2492 = shalt.err (!%p2489_p9)
}
  0xaa   :  { %124 = dma.hbm_to_vmem [thread:$0]  %s3158_s8, 16, %s122_s22, [#allocation15]  }
  0xab   :  { %s2565_s19 = smov [#allocation19]   ;;  %s2493_s7 = scalar_lea.hbm %s3160_s10, 32 }
  0xac   :  { %s143_s3 = sshll.u32 %s2565_s19, 4  ;;  %p2494_p10 = scmp.ne.s32.totalorder %s3160_s10, %s2493_s7  ;;  %s144_s3 = int_to_ptr.vmem [resolvable:$true] %s143_s3 }
  0xad   :  { %p2497_p11 = scmp.lt.u32.totalorder %s2493_s7, %s3160_s10 }
  0xaf   :  { %p2499_p12 = pnand %p2497_p11, %p2494_p10 }
  0xb1   :  { %2502 = shalt.err (!%p2499_p12)
}
  0xb2   :  { %s2503_s0 = scalar_lea.vmem %s144_s3, 32  ;;  %p2508_p0 = scmp.lt.s32.totalorder %s144_s3, %s144_s3 }
  0xb3   :  { %p2504_p13 = scmp.ne.s32.totalorder %s144_s3, %s2503_s0  ;;  %p2509_p1 = scmp.lt.s32.totalorder %s2503_s0, %s2503_s0 }
  0xb5   :  { %p2510_p2 = por %p2509_p1, %p2508_p0 }
  0xb7   :  { %p2511_p3 = pnand %p2510_p2, %p2504_p13 }
  0xb9   :  { %2514 = shalt.err (!%p2511_p3)
}
  0xba   :  { %146 = dma.hbm_to_vmem [thread:$0]  %s3160_s10, 32, %s144_s3, [#allocation18]  }
  0xbb   :  { %2537 = dma.done.wait [#allocation3], 1024  }
  0xbc   :  { %2538 = vsyncadd [#allocation3], 4294966272 }
  0xbd   :  { %2539 = dma.done.wait [#allocation6], 3072  }
  0xbe   :  { %2540 = vsyncadd [#allocation6], 4294964224 }
  0xbf   :  { %2541 = dma.done.wait [#allocation9], 2064  }
  0xc0   :  { %2542 = vsyncadd [#allocation9], 4294965232 }
  0xc1   :  { %2543 = dma.done.wait [#allocation12], 1040  }
  0xc2   :  { %2544 = vsyncadd [#allocation12], 4294966256 }
  0xc3   :  { %2545 = dma.done.wait [#allocation15], 1040  }
  0xc4   :  { %2546 = vsyncadd [#allocation15], 4294966256 }
  0xc5   :  { %2547 = dma.done.wait [#allocation18], 2080  }
  0xc6   :  { %2548 = vsyncadd [#allocation18], 4294965216  ;;  %v2566_v0 = vmov 0   ;;  %v2121_v1 = vld [vmem:[#allocation11] sm:$0xff]   ;;  %v2122_v2 = vld [vmem:[#allocation11 + $0x8] sm:$0xff]   ;;  %v217_v58 = vlaneseq  ;;  %s2568_s10 = smov [#allocation20]  }
  0xc7   :  { %2119 = vset.pattern.permute.xlu0 %v2566_v0  ;;  %2120 = vset.pattern.permute.xlu1 %v2566_v0  ;;  %v2123_v3 = vld [vmem:[#allocation11 + $0x10] sm:$0xff]   ;;  %v201_v4 = vld [vmem:[#allocation7] sm:$0xff]  ;;  %v202_v8 = vld [vmem:[#allocation7 + $0x8] sm:$0xff]  ;;  %s1792_s4 = sshll.u32 %s2568_s10, 4  ;;  %s1793_s4 = int_to_ptr.vmem [resolvable:$true] %s1792_s4 }
  0xc8   :  { %2004 = vmatprep.subr.bf16.mxu1 %v2121_v1  ;;  %v2124_v5 = vld [vmem:[#allocation11 + $0x18] sm:$0xff]   ;;  %220 = vperm.xlu0 %2119, %v201_v4   ;;  %v203_v6 = vld [vmem:[#allocation7 + $0x10] sm:$0xff]  ;;  %v2125_v10 = vld [vmem:[#allocation11 + $0x20] sm:$0xff]   ;;  %v2815_v59 = vand.u32 127, %v217_v58  ;;  %s2515_s21 = scalar_lea.vmem %s1793_s4, 2048  ;;  %p2520_p5 = scmp.lt.s32.totalorder %s1793_s4, %s1793_s4 }
  0xc9   :  { %2005 = vmatpush3.bf16.msra.mxu1 %v2121_v1  ;;  %226 = vperm.xlu1 %2120, %v203_v6   ;;  %v2129_v7 = vld [vmem:[#allocation5] sm:$0xff]   ;;  %v204_v9 = vld [vmem:[#allocation7 + $0x18] sm:$0xff]  ;;  %v206_v12 = vld [vmem:[#allocation7 + $0x28] sm:$0xff]  ;;  %p2516_p4 = scmp.ne.s32.totalorder %s1793_s4, %s2515_s21  ;;  %p2521_p6 = scmp.lt.s32.totalorder %s2515_s21, %s2515_s21 }
  0xca   :  { %2006 = vmatprep.subr.bf16.mxu1 %v2122_v2  ;;  %2020 = vmatprep.mubr.bf16.mxu1 %v2129_v7  ;;  %v205_v11 = vld [vmem:[#allocation7 + $0x20] sm:$0xff]  ;;  %v2126_v13 = vld [vmem:[#allocation11 + $0x28] sm:$0xff]   ;;  %v208_v15 = vld [vmem:[#allocation7 + $0x38] sm:$0xff] }
  0xcb   :  { %v207_v14 = vld [vmem:[#allocation7 + $0x30] sm:$0xff]  ;;  %v209_v17 = vld [vmem:[#allocation7 + $0x40] sm:$0xff]  ;;  %v210_v18 = vld [vmem:[#allocation7 + $0x48] sm:$0xff]  ;;  %p2522_p7 = por %p2521_p6, %p2520_p5 }
  0xcc   :  { %223 = vperm.xlu0 %2119, %v202_v8   ;;  %v2127_v16 = vld [vmem:[#allocation11 + $0x30] sm:$0xff]   ;;  %v2128_v19 = vld [vmem:[#allocation11 + $0x38] sm:$0xff]   ;;  %v2130_v23 = vld [vmem:[#allocation5 + $0x8] sm:$0xff]  }
  0xcd   :  { %2007 = vmatpush3.bf16.msra.mxu1 %v2122_v2  ;;  %229 = vperm.xlu1 %2120, %v204_v9   ;;  %v211_v20 = vld [vmem:[#allocation7 + $0x50] sm:$0xff]  ;;  %v212_v21 = vld [vmem:[#allocation7 + $0x58] sm:$0xff]  ;;  %v2137_v22 = vld [vmem:[#allocation2] sm:$0xff]   ;;  %v2567_v2 = vmov 1.0|1.0   ;;  %p2523_p8 = pnand %p2522_p7, %p2516_p4 }
  0xce   :  { %2008 = vmatprep.subr.bf16.mxu1 %v2123_v3  ;;  %v2138_v24 = vld [vmem:[#allocation2 + $0x8] sm:$0xff]   ;;  %v2131_v25 = vld [vmem:[#allocation5 + $0x10] sm:$0xff]   ;;  %v213_v26 = vld [vmem:[#allocation7 + $0x60] sm:$0xff]  ;;  %1972 = vmatprep.subr.bf16.mxu0 %v2137_v22 }
  0xcf   :  { %v214_v27 = vld [vmem:[#allocation7 + $0x68] sm:$0xff]  ;;  %1973 = vmatpush3.bf16.msra.mxu0 %v2137_v22  ;;  %v215_v28 = vld [vmem:[#allocation7 + $0x70] sm:$0xff]  ;;  %v216_v30 = vld [vmem:[#allocation7 + $0x78] sm:$0xff] }
  0xd0   :  { %232 = vperm.xlu0 %2119, %v205_v11   ;;  %1974 = vmatprep.subr.bf16.mxu0 %v2138_v24  ;;  %v2139_v29 = vld [vmem:[#allocation2 + $0x10] sm:$0xff]   ;;  %v2140_v31 = vld [vmem:[#allocation2 + $0x18] sm:$0xff]   ;;  %v1515_v32 = vld [vmem:[#allocation10] sm:$0xff] }
  0xd1   :  { %2009 = vmatpush3.bf16.msra.mxu1 %v2123_v3  ;;  %235 = vperm.xlu1 %2120, %v206_v12   ;;  %v2132_v33 = vld [vmem:[#allocation5 + $0x18] sm:$0xff]   ;;  %v1516_v34 = vld [vmem:[#allocation10 + $0x8] sm:$0xff]  ;;  %v2133_v35 = vld [vmem:[#allocation5 + $0x20] sm:$0xff]  }
  0xd2   :  { %2010 = vmatprep.subr.bf16.mxu1 %v2124_v5  ;;  %v2141_v36 = vld [vmem:[#allocation2 + $0x20] sm:$0xff]   ;;  %v1517_v37 = vld [vmem:[#allocation10 + $0x10] sm:$0xff]  ;;  %v2142_v39 = vld [vmem:[#allocation2 + $0x28] sm:$0xff]  }
  0xd3   :  { %1975 = vmatpush3.bf16.msra.mxu0 %v2138_v24  ;;  %v1518_v38 = vld [vmem:[#allocation10 + $0x18] sm:$0xff]  ;;  %v1519_v40 = vld [vmem:[#allocation10 + $0x20] sm:$0xff]  ;;  %v1520_v42 = vld [vmem:[#allocation10 + $0x28] sm:$0xff] }
  0xd4   :  { %238 = vperm.xlu0 %2119, %v207_v14   ;;  %1976 = vmatprep.subr.bf16.mxu0 %v2139_v29  ;;  %v2134_v41 = vld [vmem:[#allocation5 + $0x28] sm:$0xff]   ;;  %v2135_v43 = vld [vmem:[#allocation5 + $0x30] sm:$0xff]   ;;  %v1522_v46 = vld [vmem:[#allocation10 + $0x38] sm:$0xff] }
  0xd5   :  { %2011 = vmatpush3.bf16.msra.mxu1 %v2124_v5  ;;  %241 = vperm.xlu1 %2120, %v208_v15   ;;  %v2143_v44 = vld [vmem:[#allocation2 + $0x30] sm:$0xff]   ;;  %v2144_v47 = vld [vmem:[#allocation2 + $0x38] sm:$0xff]   ;;  %v1523_v48 = vld [vmem:[#allocation10 + $0x40] sm:$0xff] }
  0xd6   :  { %2012 = vmatprep.subr.bf16.mxu1 %v2125_v10  ;;  %v1521_v45 = vld [vmem:[#allocation10 + $0x30] sm:$0xff]  ;;  %v1524_v50 = vld [vmem:[#allocation10 + $0x48] sm:$0xff]  ;;  %v1526_v52 = vld [vmem:[#allocation10 + $0x58] sm:$0xff] }
  0xd7   :  { %1977 = vmatpush3.bf16.msra.mxu0 %v2139_v29  ;;  %v2136_v49 = vld [vmem:[#allocation5 + $0x38] sm:$0xff]   ;;  %v1527_v53 = vld [vmem:[#allocation10 + $0x60] sm:$0xff]  ;;  %v1528_v54 = vld [vmem:[#allocation10 + $0x68] sm:$0xff] }
  0xd8   :  { %244 = vperm.xlu0 %2119, %v209_v17   ;;  %1978 = vmatprep.subr.bf16.mxu0 %v2140_v31  ;;  %v1525_v51 = vld [vmem:[#allocation10 + $0x50] sm:$0xff]  ;;  %v1530_v56 = vld [vmem:[#allocation10 + $0x78] sm:$0xff]  ;;  %v2145_v57 = vld [vmem:[#allocation14] sm:$0xff]  }
  0xd9   :  { %2013 = vmatpush3.bf16.msra.mxu1 %v2125_v10  ;;  %247 = vperm.xlu1 %2120, %v210_v18   ;;  %v1529_v55 = vld [vmem:[#allocation10 + $0x70] sm:$0xff]  ;;  %v2148_v8 = vld [vmem:[#allocation14 + $0x18] sm:$0xff]   ;;  %v2149_v11 = vld [vmem:[#allocation14 + $0x20] sm:$0xff]  }
  0xda   :  { %2014 = vmatprep.subr.bf16.mxu1 %v2126_v13  ;;  %v2146_v1 = vld [vmem:[#allocation14 + $0x8] sm:$0xff]   ;;  %v2147_v5 = vld [vmem:[#allocation14 + $0x10] sm:$0xff]  }
  0xdb   :  { %1979 = vmatpush3.bf16.msra.mxu0 %v2140_v31  ;;  %v2150_v14 = vld [vmem:[#allocation14 + $0x28] sm:$0xff]   ;;  %v2151_v17 = vld [vmem:[#allocation14 + $0x30] sm:$0xff]  }
  0xdc   :  { %250 = vperm.xlu0 %2119, %v211_v20   ;;  %1980 = vmatprep.subr.bf16.mxu0 %v2141_v36  ;;  %v2152_v20 = vld [vmem:[#allocation14 + $0x38] sm:$0xff]  }
  0xdd   :  { %2015 = vmatpush3.bf16.msra.mxu1 %v2126_v13  ;;  %253 = vperm.xlu1 %2120, %v212_v21   ;;  %v2841_v21 = vld [vmem:[#allocation13] ss:$0 sm:$0xff] }
  0xde   :  { %2016 = vmatprep.subr.bf16.mxu1 %v2127_v16 }
  0xdf   :  { %1981 = vmatpush3.bf16.msra.mxu0 %v2141_v36 }
  0xe0   :  { %256 = vperm.xlu0 %2119, %v213_v26   ;;  %1982 = vmatprep.subr.bf16.mxu0 %v2142_v39 }
  0xe1   :  { %2017 = vmatpush3.bf16.msra.mxu1 %v2127_v16  ;;  %259 = vperm.xlu1 %2120, %v214_v27  }
  0xe2   :  { %2018 = vmatprep.subr.bf16.mxu1 %v2128_v19 }
  0xe3   :  { %1983 = vmatpush3.bf16.msra.mxu0 %v2142_v39 }
  0xe4   :  { %262 = vperm.xlu0 %2119, %v215_v28   ;;  %1984 = vmatprep.subr.bf16.mxu0 %v2143_v44 }
  0xe5   :  { %2019 = vmatpush3.bf16.msra.mxu1 %v2128_v19  ;;  %265 = vperm.xlu1 %2120, %v216_v30  }
  0xe7   :  { %1985 = vmatpush3.bf16.msra.mxu0 %v2143_v44 }
  0xe8   :  { %2021 = vmatmul.mubr.bf16.vlgmr.msra.gmra.mrb[0].mxu1 %v2130_v23  ;;  %1533 = vperm.xlu0 %2119, %v1515_v32  }
  0xe9   :  { %2024 = vmatprep.mubr.bf16.mxu1 %v2131_v25  ;;  %1538 = vperm.xlu1 %2120, %v1516_v34  }
  0xea   :  { %1986 = vmatprep.subr.bf16.mxu0 %v2144_v47 }
  0xeb   :  { %1987 = vmatpush3.bf16.msra.mxu0 %v2144_v47  ;;  %v2156_v47 = vld [vmem:[#allocation17 + $0x10] ss:$8 sps:$4 sm:$0xff]  }
  0xec   :  { %1543 = vperm.xlu0 %2119, %v1517_v37   ;;  %2036 = vmatprep.subr.bf16.mxu0 %v2145_v57  ;;  %v2153_v37 = vld [vmem:[#allocation17] ss:$8 sps:$4 sm:$0xff]  }
  0xed   :  { %1548 = vperm.xlu1 %2120, %v1518_v38   ;;  %v2155_v38 = vld [vmem:[#allocation17 + $0x4] ss:$8 sps:$4 sm:$0xff]  }
  0xee   :  { %1070 = vmatprep.subr.bf16.mxu1 %v2155_v38 }
  0xef   :  { %1071 = vmatpush1.bf16.msra.mxu1 %v2153_v37 }
  0xf0   :  { %2025 = vmatmul.mubr.bf16.gmra.mrb[4].mxu1 %v2132_v33  ;;  %1553 = vperm.xlu0 %2119, %v1519_v40  }
  0xf1   :  { %2028 = vmatprep.mubr.bf16.mxu1 %v2133_v35  ;;  %1558 = vperm.xlu1 %2120, %v1520_v42  }
  0xf4   :  { %1563 = vperm.xlu0 %2119, %v1521_v45  }
  0xf5   :  { %1568 = vperm.xlu1 %2120, %v1522_v46  }
  0xf8   :  { %2029 = vmatmul.mubr.bf16.gmra.mrb[8].mxu1 %v2134_v41  ;;  %1573 = vperm.xlu0 %2119, %v1523_v48   ;;  %v2158_v41 = vld [vmem:[#allocation17 + $0x14] ss:$8 sps:$4 sm:$0xff]  }
  0xf9   :  { %2032 = vmatprep.mubr.bf16.mxu1 %v2135_v43  ;;  %1578 = vperm.xlu1 %2120, %v1524_v50   ;;  %v2161_v50 = vld [vmem:[#allocation17 + $0x24] ss:$8 sps:$4 sm:$0xff]  }
  0xfa   :  { %1072 = vmatprep.subr.bf16.mxu1 %v2158_v41 }
  0xfb   :  { %1073 = vmatpush1.bf16.msra.mxu1 %v2156_v47 }
  0xfc   :  { %1583 = vperm.xlu0 %2119, %v1525_v51   ;;  %1074 = vmatprep.subr.bf16.mxu1 %v2161_v50  ;;  %v1851_v50 = vld [vmem:[#allocation16] ss:$0 sm:$0xff] }
  0xfd   :  { %1588 = vperm.xlu1 %2120, %v1526_v52  }
 0x100   :  { %2033 = vmatmul.mubr.bf16.gmra.mrb[12].mxu1 %v2136_v49  ;;  %1593 = vperm.xlu0 %2119, %v1527_v53  }
 0x101   :  { %1102 = vmatprep.mubr.bf16.mxu1 %v2566_v0  ;;  %1598 = vperm.xlu1 %2120, %v1528_v54   ;;  %v2159_v54 = vld [vmem:[#allocation17 + $0x20] ss:$8 sps:$4 sm:$0xff]  }
 0x102   :  { %1075 = vmatpush1.bf16.msra.mxu1 %v2159_v54 }
 0x104   :  { %1603 = vperm.xlu0 %2119, %v1529_v55  }
 0x105   :  { %1608 = vperm.xlu1 %2120, %v1530_v56  }
 0x147   :  { %v221_v60 = vpop.permute.xlu0 %220 }
 0x148   :  { %v227_v61 = vpop.permute.xlu1 %226  ;;  %vm267_vm0 = vcmp.eq.s32.totalorder %v221_v60, %v2815_v59 }
 0x149   :  { %vm269_vm1 = vcmp.eq.s32.totalorder %v227_v61, %v2815_v59 }
 0x14b   :  { %v224_v62 = vpop.permute.xlu0 %223 }
 0x14c   :  { %vm268_vm2 = vcmp.eq.s32.totalorder %v224_v62, %v2815_v59  ;;  %v230_v63 = vpop.permute.xlu1 %229 }
 0x14d   :  { %vm270_vm3 = vcmp.eq.s32.totalorder %v230_v63, %v2815_v59  ;;  %vm1818_vm4 = vmpackc.low %vm268_vm2, %vm267_vm0 }
 0x14e   :  { %vm1820_vm5 = vmpackc.low %vm270_vm3, %vm269_vm1  ;;  %1988 = vmatprep.mubr.msk.bf16.mxu0 %vm1818_vm4, %v2567_v2 }
 0x14f   :  { %v233_v3 = vpop.permute.xlu0 %232  ;;  %1989 = vmatmul.mubr.msk.bf16.vlgmr.msra.gmra.mrb[0].mxu0 %vm1820_vm5, %v2567_v2 }
 0x150   :  { %vm271_vm6 = vcmp.eq.s32.totalorder %v233_v3, %v2815_v59  ;;  %v236_v4 = vpop.permute.xlu1 %235  ;;  %2037 = vmatpush3.bf16.msra.mxu0 %v2145_v57  ;;  %v2164_v57 = vld [vmem:[#allocation17 + $0x34] ss:$8 sps:$4 sm:$0xff]  }
 0x151   :  { %vm272_vm7 = vcmp.eq.s32.totalorder %v236_v4, %v2815_v59  ;;  %2038 = vmatprep.subr.bf16.mxu0 %v2146_v1  ;;  %v2162_v4 = vld [vmem:[#allocation17 + $0x30] ss:$8 sps:$4 sm:$0xff]   ;;  %1076 = vmatprep.subr.bf16.mxu1 %v2164_v57 }
 0x152   :  { %vm1822_vm8 = vmpackc.low %vm272_vm7, %vm271_vm6  ;;  %1077 = vmatpush1.bf16.msra.mxu1 %v2162_v4 }
 0x153   :  { %v239_v6 = vpop.permute.xlu0 %238  ;;  %1992 = vmatprep.mubr.msk.bf16.mxu0 %vm1822_vm8, %v2567_v2 }
 0x154   :  { %vm273_vm9 = vcmp.eq.s32.totalorder %v239_v6, %v2815_v59  ;;  %v242_v7 = vpop.permute.xlu1 %241  ;;  %2039 = vmatpush3.bf16.msra.mxu0 %v2146_v1 }
 0x155   :  { %vm274_vm10 = vcmp.eq.s32.totalorder %v242_v7, %v2815_v59  ;;  %2040 = vmatprep.subr.bf16.mxu0 %v2147_v5  ;;  %v2167_v7 = vld [vmem:[#allocation17 + $0x44] ss:$8 sps:$4 sm:$0xff]  }
 0x156   :  { %vm1824_vm11 = vmpackc.low %vm274_vm10, %vm273_vm9  ;;  %1078 = vmatprep.subr.bf16.mxu1 %v2167_v7 }
 0x157   :  { %v245_v9 = vpop.permute.xlu0 %244  ;;  %1993 = vmatmul.mubr.msk.bf16.gmra.mrb[4].mxu0 %vm1824_vm11, %v2567_v2 }
 0x158   :  { %vm275_vm12 = vcmp.eq.s32.totalorder %v245_v9, %v2815_v59  ;;  %v248_v10 = vpop.permute.xlu1 %247  ;;  %2041 = vmatpush3.bf16.msra.mxu0 %v2147_v5 }
 0x159   :  { %vm276_vm13 = vcmp.eq.s32.totalorder %v248_v10, %v2815_v59  ;;  %2042 = vmatprep.subr.bf16.mxu0 %v2148_v8 }
 0x15a   :  { %vm1826_vm14 = vmpackc.low %vm276_vm13, %vm275_vm12 }
 0x15b   :  { %v251_v12 = vpop.permute.xlu0 %250  ;;  %1996 = vmatprep.mubr.msk.bf16.mxu0 %vm1826_vm14, %v2567_v2 }
 0x15c   :  { %vm277_vm15 = vcmp.eq.s32.totalorder %v251_v12, %v2815_v59  ;;  %v254_v13 = vpop.permute.xlu1 %253  ;;  %2043 = vmatpush3.bf16.msra.mxu0 %v2148_v8 }
 0x15d   :  { %vm278_vm0 = vcmp.eq.s32.totalorder %v254_v13, %v2815_v59  ;;  %2044 = vmatprep.subr.bf16.mxu0 %v2149_v11 }
 0x15e   :  { %vm1828_vm1 = vmpackc.low %vm278_vm0, %vm277_vm15 }
 0x15f   :  { %v257_v15 = vpop.permute.xlu0 %256  ;;  %1997 = vmatmul.mubr.msk.bf16.gmra.mrb[8].mxu0 %vm1828_vm1, %v2567_v2 }
 0x160   :  { %vm279_vm2 = vcmp.eq.s32.totalorder %v257_v15, %v2815_v59  ;;  %v260_v16 = vpop.permute.xlu1 %259  ;;  %2045 = vmatpush3.bf16.msra.mxu0 %v2149_v11  ;;  %v2165_v11 = vld [vmem:[#allocation17 + $0x40] ss:$8 sps:$4 sm:$0xff]  }
 0x161   :  { %vm280_vm3 = vcmp.eq.s32.totalorder %v260_v16, %v2815_v59  ;;  %2046 = vmatprep.subr.bf16.mxu0 %v2150_v14  ;;  %1079 = vmatpush1.bf16.msra.mxu1 %v2165_v11 }
 0x162   :  { %vm1830_vm4 = vmpackc.low %vm280_vm3, %vm279_vm2 }
 0x163   :  { %v263_v18 = vpop.permute.xlu0 %262  ;;  %2000 = vmatprep.mubr.msk.bf16.mxu0 %vm1830_vm4, %v2567_v2 }
 0x164   :  { %vm281_vm5 = vcmp.eq.s32.totalorder %v263_v18, %v2815_v59  ;;  %v266_v19 = vpop.permute.xlu1 %265  ;;  %2047 = vmatpush3.bf16.msra.mxu0 %v2150_v14  ;;  %v2170_v14 = vld [vmem:[#allocation17 + $0x54] ss:$8 sps:$4 sm:$0xff]  }
 0x165   :  { %vm282_vm6 = vcmp.eq.s32.totalorder %v266_v19, %v2815_v59  ;;  %2048 = vmatprep.subr.bf16.mxu0 %v2151_v17  ;;  %1080 = vmatprep.subr.bf16.mxu1 %v2170_v14 }
 0x166   :  { %vm1832_vm7 = vmpackc.low %vm282_vm6, %vm281_vm5 }
 0x167   :  { %2001 = vmatmul.mubr.msk.bf16.gmra.mrb[12].mxu0 %vm1832_vm7, %v2567_v2 }
 0x168   :  { %2049 = vmatpush3.bf16.msra.mxu0 %v2151_v17 }
 0x169   :  { %2050 = vmatprep.subr.bf16.mxu0 %v2152_v20 }
 0x16c   :  { %2051 = vmatpush3.bf16.msra.mxu0 %v2152_v20 }
 0x1bb   :  { %v2022_v22 = vpop.f32.mrb[0].mxu1 }
 0x1bc   :  { %v708_v23 = vadd.f32 %v2022_v22, %v2841_v21  ;;  %v699_v24 = vpop.f32.mrb[1].mxu1 }
 0x1bd   :  { %v700_v25 = vadd.f32 %v2841_v21, %v699_v24  ;;  %v2023_v26 = vpop.f32.mrb[2].mxu1 }
 0x1be   :  { %v711_v27 = vadd.f32 %v2023_v26, %v2841_v21  ;;  %v702_v28 = vpop.f32.mrb[3].mxu1  ;;  %v764_v30 = vmax.f32 %v708_v23, 0.0  ;;  %v2168_v23 = vld [vmem:[#allocation17 + $0x50] ss:$8 sps:$4 sm:$0xff]  }
 0x1bf   :  { %v703_v29 = vadd.f32 %v2841_v21, %v702_v28  ;;  %v762_v32 = vmax.f32 %v700_v25, 0.0  ;;  %1081 = vmatpush1.bf16.msra.mxu1 %v2168_v23 }
 0x1c0   :  { %v765_v31 = vmax.f32 %v711_v27, 0.0 }
 0x1c1   :  { %v763_v33 = vmax.f32 %v703_v29, 0.0 }
 0x1c2   :  { %v779_v34 = vpack.c.bf16 %v765_v31, %v764_v30  ;;  %v2173_v30 = vld [vmem:[#allocation17 + $0x64] ss:$8 sps:$4 sm:$0xff]   ;;  %v2171_v31 = vld [vmem:[#allocation17 + $0x60] ss:$8 sps:$4 sm:$0xff]  }
 0x1c3   :  { %v778_v35 = vpack.c.bf16 %v763_v33, %v762_v32  ;;  %v2026_v36 = vpop.f32.mrb[4].mxu1  ;;  %1082 = vmatprep.subr.bf16.mxu1 %v2173_v30  ;;  %v2176_v32 = vld [vmem:[#allocation17 + $0x74] ss:$8 sps:$4 sm:$0xff]   ;;  %v2174_v33 = vld [vmem:[#allocation17 + $0x70] ss:$8 sps:$4 sm:$0xff]   ;;  %v2899_v30 = vshrl.u32 %v217_v58, 7 }
 0x1c4   :  { %v724_v39 = vadd.f32 %v2026_v36, %v2841_v21  ;;  %v715_v40 = vpop.f32.mrb[5].mxu1  ;;  %1083 = vmatpush1.bf16.msra.mxu1 %v2171_v31 }
 0x1c5   :  { %v716_v42 = vadd.f32 %v2841_v21, %v715_v40  ;;  %2052 = vmatprep.mubr.bf16.mxu0 %v778_v35  ;;  %v2027_v43 = vpop.f32.mrb[6].mxu1  ;;  %1084 = vmatprep.subr.bf16.mxu1 %v2176_v32  ;;  %v310_v31 = vadd.s32 8, %v2899_v30  ;;  %v2902_v32 = vld [vmem:[#allocation8] ss:$0 sm:$0xff] }
 0x1c6   :  { %v768_v44 = vmax.f32 %v724_v39, 0.0  ;;  %v727_v45 = vadd.f32 %v2027_v43, %v2841_v21  ;;  %2053 = vmatmul.mubr.bf16.vlgmr.msra.gmra.mrb[16].mxu0 %v779_v34  ;;  %v718_v46 = vpop.f32.mrb[7].mxu1  ;;  %vm329_vm8 = vcmp.eq.s32.totalorder %v2902_v32, %v2899_v30 }
 0x1c7   :  { %v766_v48 = vmax.f32 %v716_v42, 0.0  ;;  %v719_v49 = vadd.f32 %v2841_v21, %v718_v46  ;;  %vm330_vm9 = vcmp.eq.s32.totalorder %v2902_v32, %v310_v31 }
 0x1c8   :  { %v769_v51 = vmax.f32 %v727_v45, 0.0  ;;  %1085 = vmatpush1.bf16.msra.mxu1 %v2174_v33  ;;  %vm1892_vm10 = vmpackc.low %vm330_vm9, %vm329_vm8  ;;  %v982_v33 = vsub.s32 0, %v2899_v30 }
 0x1c9   :  { %v767_v52 = vmax.f32 %v719_v49, 0.0 }
 0x1ca   :  { %v781_v53 = vpack.c.bf16 %v769_v51, %v768_v44 }
 0x1cb   :  { %v780_v55 = vpack.c.bf16 %v767_v52, %v766_v48  ;;  %v2030_v56 = vpop.f32.mrb[8].mxu1 }
 0x1cc   :  { %v740_v59 = vadd.f32 %v2030_v56, %v2841_v21  ;;  %v731_v60 = vpop.f32.mrb[9].mxu1 }
 0x1cd   :  { %2056 = vmatprep.mubr.bf16.mxu0 %v780_v55  ;;  %v732_v61 = vadd.f32 %v2841_v21, %v731_v60  ;;  %v2031_v62 = vpop.f32.mrb[10].mxu1 }
 0x1ce   :  { %2057 = vmatmul.mubr.bf16.gmra.mrb[20].mxu0 %v781_v53  ;;  %v772_v63 = vmax.f32 %v740_v59, 0.0  ;;  %v743_v1 = vadd.f32 %v2031_v62, %v2841_v21  ;;  %v734_v3 = vpop.f32.mrb[11].mxu1 }
 0x1cf   :  { %v770_v5 = vmax.f32 %v732_v61, 0.0  ;;  %v735_v6 = vadd.f32 %v2841_v21, %v734_v3 }
 0x1d0   :  { %v773_v8 = vmax.f32 %v743_v1, 0.0 }
 0x1d1   :  { %v771_v9 = vmax.f32 %v735_v6, 0.0 }
 0x1d2   :  { %v783_v10 = vpack.c.bf16 %v773_v8, %v772_v63 }
 0x1d3   :  { %v782_v12 = vpack.c.bf16 %v771_v9, %v770_v5  ;;  %v2034_v13 = vpop.f32.mrb[12].mxu1 }
 0x1d4   :  { %v756_v15 = vadd.f32 %v2034_v13, %v2841_v21  ;;  %v747_v16 = vpop.f32.mrb[13].mxu1 }
 0x1d5   :  { %2060 = vmatprep.mubr.bf16.mxu0 %v782_v12  ;;  %v748_v17 = vadd.f32 %v2841_v21, %v747_v16  ;;  %v2035_v18 = vpop.f32.mrb[14].mxu1 }
 0x1d6   :  { %2061 = vmatmul.mubr.bf16.gmra.mrb[24].mxu0 %v783_v10  ;;  %v776_v19 = vmax.f32 %v756_v15, 0.0  ;;  %v759_v20 = vadd.f32 %v2035_v18, %v2841_v21  ;;  %v750_v22 = vpop.f32.mrb[15].mxu1 }
 0x1d7   :  { %v774_v24 = vmax.f32 %v748_v17, 0.0  ;;  %v751_v25 = vadd.f32 %v2841_v21, %v750_v22 }
 0x1d8   :  { %v777_v26 = vmax.f32 %v759_v20, 0.0 }
 0x1d9   :  { %v775_v27 = vmax.f32 %v751_v25, 0.0 }
 0x1da   :  { %v785_v28 = vpack.c.bf16 %v777_v26, %v776_v19 }
 0x1db   :  { %v784_v29 = vpack.c.bf16 %v775_v27, %v774_v24 }
 0x1dd   :  { %2064 = vmatprep.mubr.bf16.mxu0 %v784_v29 }
 0x1de   :  { %2065 = vmatmul.mubr.bf16.gmra.mrb[28].mxu0 %v785_v28 }
 0x1df   :  { %2084 = vmatprep.mubr.msk.bf16.mxu0 %vm1892_vm10, %v2567_v2 }
 0x222   :  { %v2859_v34 = vpop.f32.mrb[0].mxu0 }
 0x223   :  { %v2861_v35 = vpop.f32.mrb[1].mxu0 }
 0x224   :  { %v2863_v21 = vpop.f32.mrb[2].mxu0 }
 0x225   :  { %v2865_v36 = vpop.f32.mrb[3].mxu0 }
 0x22a   :  { %v2867_v37 = vpop.f32.mrb[4].mxu0 }
 0x22b   :  { %v2869_v38 = vpop.f32.mrb[5].mxu0 }
 0x22c   :  { %v2871_v39 = vpop.f32.mrb[6].mxu0 }
 0x22d   :  { %v2873_v40 = vpop.f32.mrb[7].mxu0 }
 0x232   :  { %v2875_v41 = vpop.f32.mrb[8].mxu0 }
 0x233   :  { %v2877_v42 = vpop.f32.mrb[9].mxu0 }
 0x234   :  { %v2879_v43 = vpop.f32.mrb[10].mxu0 }
 0x235   :  { %v2881_v44 = vpop.f32.mrb[11].mxu0 }
 0x23a   :  { %v2883_v45 = vpop.f32.mrb[12].mxu0 }
 0x23b   :  { %v2885_v46 = vpop.f32.mrb[13].mxu0 }
 0x23c   :  { %v2887_v47 = vpop.f32.mrb[14].mxu0 }
 0x23d   :  { %v2889_v48 = vpop.f32.mrb[15].mxu0 }
 0x299   :  { %v2054_v49 = vpop.f32.mrb[16].mxu0 }
 0x29a   :  { %v891_v51 = vpop.f32.mrb[17].mxu0  ;;  %v900_v53 = vadd.f32 %v2054_v49, %v1851_v50  ;;  %v978_v49 = vld [vmem:[#allocation19] sm:$0x3] }
 0x29b   :  { %v2055_v52 = vpop.f32.mrb[18].mxu0  ;;  %v892_v56 = vadd.f32 %v1851_v50, %v891_v51 }
 0x29c   :  { %v903_v54 = vadd.f32 %v2055_v52, %v1851_v50  ;;  %v894_v55 = vpop.f32.mrb[19].mxu0 }
 0x29d   :  { %v895_v57 = vadd.f32 %v1851_v50, %v894_v55 }
 0x29e   :  { %v955_v59 = vpack.c.bf16 %v903_v54, %v900_v53 }
 0x29f   :  { %v954_v60 = vpack.c.bf16 %v895_v57, %v892_v56 }
 0x2a1   :  { %1103 = vmatmul.mubr.bf16.vlgmr.msra.gmra.mrb[16].mxu1 %v954_v60  ;;  %v2058_v61 = vpop.f32.mrb[20].mxu0 }
 0x2a2   :  { %v916_v62 = vadd.f32 %v2058_v61, %v1851_v50  ;;  %v907_v63 = vpop.f32.mrb[21].mxu0  ;;  %1112 = vmatprep.mubr.bf16.mxu1 %v2566_v0 }
 0x2a3   :  { %v908_v1 = vadd.f32 %v1851_v50, %v907_v63  ;;  %v2059_v3 = vpop.f32.mrb[22].mxu0 }
 0x2a4   :  { %v919_v4 = vadd.f32 %v2059_v3, %v1851_v50  ;;  %v910_v5 = vpop.f32.mrb[23].mxu0 }
 0x2a5   :  { %v911_v6 = vadd.f32 %v1851_v50, %v910_v5 }
 0x2a6   :  { %v957_v7 = vpack.c.bf16 %v919_v4, %v916_v62 }
 0x2a7   :  { %v956_v8 = vpack.c.bf16 %v911_v6, %v908_v1 }
 0x2a9   :  { %1113 = vmatmul.mubr.bf16.gmra.mrb[20].mxu1 %v955_v59  ;;  %v2062_v9 = vpop.f32.mrb[24].mxu0 }
 0x2aa   :  { %1122 = vmatprep.mubr.bf16.mxu1 %v2566_v0  ;;  %v932_v10 = vadd.f32 %v2062_v9, %v1851_v50  ;;  %v923_v11 = vpop.f32.mrb[25].mxu0 }
 0x2ab   :  { %v924_v12 = vadd.f32 %v1851_v50, %v923_v11  ;;  %v2063_v13 = vpop.f32.mrb[26].mxu0 }
 0x2ac   :  { %v935_v14 = vadd.f32 %v2063_v13, %v1851_v50  ;;  %v926_v15 = vpop.f32.mrb[27].mxu0 }
 0x2ad   :  { %v927_v16 = vadd.f32 %v1851_v50, %v926_v15  ;;  %v986_v15 = vsub.s32 1, %v2899_v30 }
 0x2ae   :  { %v959_v17 = vpack.c.bf16 %v935_v14, %v932_v10 }
 0x2af   :  { %v958_v18 = vpack.c.bf16 %v927_v16, %v924_v12 }
 0x2b1   :  { %1123 = vmatmul.mubr.bf16.gmra.mrb[24].mxu1 %v956_v8  ;;  %v2066_v19 = vpop.f32.mrb[28].mxu0 }
 0x2b2   :  { %1132 = vmatprep.mubr.bf16.mxu1 %v2566_v0  ;;  %v948_v20 = vadd.f32 %v2066_v19, %v1851_v50  ;;  %v939_v22 = vpop.f32.mrb[29].mxu0 }
 0x2b3   :  { %v940_v23 = vadd.f32 %v1851_v50, %v939_v22  ;;  %v2067_v24 = vpop.f32.mrb[30].mxu0  ;;  %v2926_v22 = vrot.slane %v978_v49, %v986_v15 }
 0x2b4   :  { %v951_v25 = vadd.f32 %v2067_v24, %v1851_v50  ;;  %v942_v26 = vpop.f32.mrb[31].mxu0 }
 0x2b5   :  { %v943_v27 = vadd.f32 %v1851_v50, %v942_v26 }
 0x2b6   :  { %v961_v28 = vpack.c.bf16 %v951_v25, %v948_v20 }
 0x2b7   :  { %v960_v29 = vpack.c.bf16 %v943_v27, %v940_v23 }
 0x2b9   :  { %1133 = vmatmul.mubr.bf16.gmra.mrb[28].mxu1 %v957_v7 }
 0x2ba   :  { %1142 = vmatprep.mubr.bf16.mxu1 %v2566_v0 }
 0x2c1   :  { %1143 = vmatmul.mubr.bf16.gmra.mrb[32].mxu1 %v958_v18 }
 0x2c2   :  { %1152 = vmatprep.mubr.bf16.mxu1 %v2566_v0 }
 0x2c9   :  { %1153 = vmatmul.mubr.bf16.gmra.mrb[36].mxu1 %v959_v17 }
 0x2ca   :  { %1162 = vmatprep.mubr.bf16.mxu1 %v2566_v0 }
 0x2d1   :  { %1163 = vmatmul.mubr.bf16.gmra.mrb[40].mxu1 %v960_v29 }
 0x2d2   :  { %1172 = vmatprep.mubr.bf16.mxu1 %v2566_v0  ;;  %v2909_v0 = vrot.slane %v978_v49, %v982_v33 }
 0x2d9   :  { %1173 = vmatmul.mubr.bf16.gmra.mrb[44].mxu1 %v961_v28 }
 0x374   :  { %v1104_v50 = vpop.f32.mrb[16].mxu1 }
 0x375   :  { %v1105_v58 = vadd.f32 %v1104_v50, %v2909_v0  ;;  %v1106_v51 = vpop.f32.mrb[17].mxu1 }
 0x376   :  { %v1108_v52 = vpop.f32.mrb[18].mxu1  ;;  %v1107_v33 = vadd.f32 %v1106_v51, %v2926_v22 }
 0x377   :  { %v1876_v53 = vmul.f32 -1.442695, %v1105_v58  ;;  %v1109_v54 = vadd.f32 %v1108_v52, %v2909_v0  ;;  %v1110_v55 = vpop.f32.mrb[19].mxu1 }
 0x379   :  { %2177 = vpow2.f32 %v1876_v53  ;;  %v1877_v56 = vmul.f32 -1.442695, %v1109_v54  ;;  %v1111_v54 = vadd.f32 %v1110_v55, %v2926_v22 }
 0x37b   :  { %2179 = vpow2.f32 %v1877_v56 }
 0x37c   :  { %v1114_v57 = vpop.f32.mrb[20].mxu1 }
 0x37d   :  { %v1115_v59 = vadd.f32 %v1114_v57, %v2909_v0  ;;  %v2914_v60 = vpop.f32.mrb[21].mxu1 }
 0x37e   :  { %v1118_v61 = vpop.f32.mrb[22].mxu1 }
 0x37f   :  { %v1878_v62 = vmul.f32 -1.442695, %v1115_v59  ;;  %v1119_v63 = vadd.f32 %v1118_v61, %v2909_v0  ;;  %v2917_v1 = vpop.f32.mrb[23].mxu1 }
 0x381   :  { %2181 = vpow2.f32 %v1878_v62  ;;  %v1879_v3 = vmul.f32 -1.442695, %v1119_v63 }
 0x383   :  { %v2178_v4 = vpop.eup %2177  ;;  %2183 = vpow2.f32 %v1879_v3 }
 0x384   :  { %v1231_v5 = vadd.f32 1.0, %v2178_v4  ;;  %v1124_v6 = vpop.f32.mrb[24].mxu1 }
 0x385   :  { %v2180_v7 = vpop.eup %2179  ;;  %v1125_v8 = vadd.f32 %v1124_v6, %v2909_v0  ;;  %v2920_v9 = vpop.f32.mrb[25].mxu1 }
 0x386   :  { %2185 = vrcp.f32 %v1231_v5  ;;  %v1232_v10 = vadd.f32 1.0, %v2180_v7  ;;  %v1128_v11 = vpop.f32.mrb[26].mxu1 }
 0x387   :  { %v1880_v12 = vmul.f32 -1.442695, %v1125_v8  ;;  %v1129_v13 = vadd.f32 %v1128_v11, %v2909_v0  ;;  %v2923_v14 = vpop.f32.mrb[27].mxu1 }
 0x388   :  { %2187 = vrcp.f32 %v1232_v10  ;;  %v1117_v10 = vadd.f32 %v2914_v60, %v2926_v22 }
 0x389   :  { %2189 = vpow2.f32 %v1880_v12  ;;  %v1881_v16 = vmul.f32 -1.442695, %v1129_v13 }
 0x38b   :  { %v2182_v17 = vpop.eup %2181  ;;  %2191 = vpow2.f32 %v1881_v16  ;;  %v1121_v16 = vadd.f32 %v2917_v1, %v2926_v22 }
 0x38c   :  { %v1233_v18 = vadd.f32 1.0, %v2182_v17  ;;  %v1134_v19 = vpop.f32.mrb[28].mxu1 }
 0x38d   :  { %v2184_v20 = vpop.eup %2183  ;;  %v1135_v23 = vadd.f32 %v1134_v19, %v2909_v0  ;;  %v2929_v24 = vpop.f32.mrb[29].mxu1 }
 0x38e   :  { %2193 = vrcp.f32 %v1233_v18  ;;  %v1234_v25 = vadd.f32 1.0, %v2184_v20  ;;  %v1138_v26 = vpop.f32.mrb[30].mxu1 }
 0x38f   :  { %v1882_v27 = vmul.f32 -1.442695, %v1135_v23  ;;  %v1139_v28 = vadd.f32 %v1138_v26, %v2909_v0  ;;  %v2932_v29 = vpop.f32.mrb[31].mxu1 }
 0x390   :  { %v2186_v31 = vpop.eup %2185  ;;  %2195 = vrcp.f32 %v1234_v25 }
 0x391   :  { %v1279_v50 = vmul.f32 %v2186_v31, %v2861_v35  ;;  %2197 = vpow2.f32 %v1882_v27  ;;  %v1883_v49 = vmul.f32 -1.442695, %v1139_v28 }
 0x392   :  { %v2188_v58 = vpop.eup %2187 }
 0x393   :  { %v2190_v52 = vpop.eup %2189  ;;  %v1295_v53 = vadd.f32 %v1279_v50, %v1107_v33  ;;  %v1280_v56 = vmul.f32 %v2188_v58, %v2865_v36  ;;  %2199 = vpow2.f32 %v1883_v49 }
 0x394   :  { %v1235_v57 = vadd.f32 1.0, %v2190_v52  ;;  %v1144_v59 = vpop.f32.mrb[32].mxu1 }
 0x395   :  { %v2192_v61 = vpop.eup %2191  ;;  %v1311_v62 = vmul.f32 %v1295_v53, %v1295_v53  ;;  %v1296_v63 = vadd.f32 %v1280_v56, %v1111_v54  ;;  %v1145_v3 = vadd.f32 %v1144_v59, %v2909_v0  ;;  %v2939_v51 = vpop.f32.mrb[33].mxu1 }
 0x396   :  { %2201 = vrcp.f32 %v1235_v57  ;;  %v1236_v35 = vadd.f32 1.0, %v2192_v61  ;;  %v1148_v4 = vpop.f32.mrb[34].mxu1  ;;  %v1131_v61 = vadd.f32 %v2923_v14, %v2926_v22 }
 0x397   :  { %v1312_v5 = vmul.f32 %v1296_v63, %v1296_v63  ;;  %v1884_v6 = vmul.f32 -1.442695, %v1145_v3  ;;  %v1149_v7 = vadd.f32 %v1148_v4, %v2909_v0  ;;  %v2942_v55 = vpop.f32.mrb[35].mxu1  ;;  %v1327_v8 = vsub.f32 %v1311_v62, %v1295_v53 }
 0x398   :  { %v2194_v36 = vpop.eup %2193  ;;  %2203 = vrcp.f32 %v1236_v35  ;;  %v1127_v53 = vadd.f32 %v2920_v9, %v2926_v22 }
 0x399   :  { %v1328_v11 = vsub.f32 %v1312_v5, %v1296_v63  ;;  %v1281_v12 = vmul.f32 %v2194_v36, %v2859_v34  ;;  %2205 = vpow2.f32 %v1884_v6  ;;  %v1885_v13 = vmul.f32 -1.442695, %v1149_v7 }
 0x39a   :  { %v2196_v15 = vpop.eup %2195 }
 0x39b   :  { %v2198_v17 = vpop.eup %2197  ;;  %v1297_v18 = vadd.f32 %v1281_v12, %v1117_v10  ;;  %v1282_v19 = vmul.f32 %v2196_v15, %v2863_v21  ;;  %2207 = vpow2.f32 %v1885_v13  ;;  %v1359_v20 = vpack.c.bf16 %v1328_v11, %v1327_v8 }
 0x39c   :  { %v1237_v23 = vadd.f32 1.0, %v2198_v17  ;;  %v1154_v25 = vpop.f32.mrb[36].mxu1 }
 0x39d   :  { %v2200_v26 = vpop.eup %2199  ;;  %v1313_v60 = vmul.f32 %v1297_v18, %v1297_v18  ;;  %v1298_v27 = vadd.f32 %v1282_v19, %v1121_v16  ;;  %v1155_v28 = vadd.f32 %v1154_v25, %v2909_v0  ;;  %v2951_v34 = vpop.f32.mrb[37].mxu1  ;;  %2068 = vmatprep.subr.bf16.mxu0 %v1359_v20  ;;  %v1137_v16 = vadd.f32 %v2929_v24, %v2926_v22 }
 0x39e   :  { %2209 = vrcp.f32 %v1237_v23  ;;  %v1238_v31 = vadd.f32 1.0, %v2200_v26  ;;  %v1158_v33 = vpop.f32.mrb[38].mxu1  ;;  %2069 = vmatpush3.bf16.msra.mxu0 %v1359_v20  ;;  %v1141_v23 = vadd.f32 %v2932_v29, %v2926_v22 }
 0x39f   :  { %v1314_v1 = vmul.f32 %v1298_v27, %v1298_v27  ;;  %v1886_v50 = vmul.f32 -1.442695, %v1155_v28  ;;  %v1159_v21 = vadd.f32 %v1158_v33, %v2909_v0  ;;  %v2954_v49 = vpop.f32.mrb[39].mxu1  ;;  %v1329_v52 = vsub.f32 %v1313_v60, %v1297_v18 }
 0x3a0   :  { %v2202_v58 = vpop.eup %2201  ;;  %2211 = vrcp.f32 %v1238_v31 }
 0x3a1   :  { %v1330_v54 = vsub.f32 %v1314_v1, %v1298_v27  ;;  %v1283_v56 = vmul.f32 %v2202_v58, %v2869_v38  ;;  %2213 = vpow2.f32 %v1886_v50  ;;  %v1887_v57 = vmul.f32 -1.442695, %v1159_v21 }
 0x3a2   :  { %v2204_v59 = vpop.eup %2203 }
 0x3a3   :  { %v2206_v62 = vpop.eup %2205  ;;  %v1299_v63 = vadd.f32 %v1283_v56, %v1127_v53  ;;  %v1284_v3 = vmul.f32 %v2204_v59, %v2873_v40  ;;  %2215 = vpow2.f32 %v1887_v57  ;;  %v1360_v35 = vpack.c.bf16 %v1330_v54, %v1329_v52 }
 0x3a4   :  { %v1239_v4 = vadd.f32 1.0, %v2206_v62  ;;  %v1164_v5 = vpop.f32.mrb[40].mxu1  ;;  %v1147_v57 = vadd.f32 %v2939_v51, %v2926_v22 }
 0x3a5   :  { %v2208_v6 = vpop.eup %2207  ;;  %v1315_v9 = vmul.f32 %v1299_v63, %v1299_v63  ;;  %v1300_v7 = vadd.f32 %v1284_v3, %v1131_v61  ;;  %v1165_v36 = vadd.f32 %v1164_v5, %v2909_v0  ;;  %v2963_v38 = vpop.f32.mrb[41].mxu1  ;;  %2070 = vmatprep.subr.bf16.mxu0 %v1360_v35  ;;  %v1151_v3 = vadd.f32 %v2942_v55, %v2926_v22 }
 0x3a6   :  { %2217 = vrcp.f32 %v1239_v4  ;;  %v1240_v8 = vadd.f32 1.0, %v2208_v6  ;;  %v1168_v10 = vpop.f32.mrb[42].mxu1  ;;  %2071 = vmatpush3.bf16.msra.mxu0 %v1360_v35  ;;  %v1157_v55 = vadd.f32 %v2951_v34, %v2926_v22 }
 0x3a7   :  { %v1316_v14 = vmul.f32 %v1300_v7, %v1300_v7  ;;  %v1888_v11 = vmul.f32 -1.442695, %v1165_v36  ;;  %v1169_v40 = vadd.f32 %v1168_v10, %v2909_v0  ;;  %v2966_v12 = vpop.f32.mrb[43].mxu1  ;;  %v1331_v15 = vsub.f32 %v1315_v9, %v1299_v63 }
 0x3a8   :  { %v2210_v13 = vpop.eup %2209  ;;  %2219 = vrcp.f32 %v1240_v8 }
 0x3a9   :  { %v1332_v17 = vsub.f32 %v1316_v14, %v1300_v7  ;;  %v1285_v18 = vmul.f32 %v2210_v13, %v2867_v37  ;;  %2221 = vpow2.f32 %v1888_v11  ;;  %v1889_v19 = vmul.f32 -1.442695, %v1169_v40 }
 0x3aa   :  { %v2212_v20 = vpop.eup %2211 }
 0x3ab   :  { %v2214_v25 = vpop.eup %2213  ;;  %v1301_v26 = vadd.f32 %v1285_v18, %v1137_v16  ;;  %v1286_v60 = vmul.f32 %v2212_v20, %v2871_v39  ;;  %2223 = vpow2.f32 %v1889_v19  ;;  %v1361_v27 = vpack.c.bf16 %v1332_v17, %v1331_v15 }
 0x3ac   :  { %v1241_v28 = vadd.f32 1.0, %v2214_v25  ;;  %v1174_v31 = vpop.f32.mrb[44].mxu1  ;;  %v1161_v15 = vadd.f32 %v2954_v49, %v2926_v22 }
 0x3ad   :  { %v2216_v33 = vpop.eup %2215  ;;  %v1317_v24 = vmul.f32 %v1301_v26, %v1301_v26  ;;  %v1302_v1 = vadd.f32 %v1286_v60, %v1141_v23  ;;  %v1175_v50 = vadd.f32 %v1174_v31, %v2909_v0  ;;  %v2975_v37 = vpop.f32.mrb[45].mxu1  ;;  %2072 = vmatprep.subr.bf16.mxu0 %v1361_v27  ;;  %v1171_v31 = vadd.f32 %v2966_v12, %v2926_v22 }
 0x3ae   :  { %2225 = vrcp.f32 %v1241_v28  ;;  %v1242_v21 = vadd.f32 1.0, %v2216_v33  ;;  %v1178_v58 = vpop.f32.mrb[46].mxu1  ;;  %2073 = vmatpush3.bf16.msra.mxu0 %v1361_v27  ;;  %v1167_v27 = vadd.f32 %v2963_v38, %v2926_v22  ;;  %v1177_v38 = vadd.f32 %v2975_v37, %v2926_v22 }
 0x3af   :  { %v1318_v29 = vmul.f32 %v1302_v1, %v1302_v1  ;;  %v1890_v52 = vmul.f32 -1.442695, %v1175_v50  ;;  %v1179_v39 = vadd.f32 %v1178_v58, %v2909_v0  ;;  %v2978_v53 = vpop.f32.mrb[47].mxu1  ;;  %v1333_v56 = vsub.f32 %v1317_v24, %v1301_v26 }
 0x3b0   :  { %v2218_v54 = vpop.eup %2217  ;;  %2227 = vrcp.f32 %v1242_v21  ;;  %v1181_v12 = vadd.f32 %v2978_v53, %v2926_v22  ;;  %v313_v37 = vadd.s32 32, %v2899_v30  ;;  %v316_v22 = vadd.s32 56, %v2899_v30 }
 0x3b1   :  { %v1334_v59 = vsub.f32 %v1318_v29, %v1302_v1  ;;  %v1287_v61 = vmul.f32 %v2218_v54, %v2877_v42  ;;  %2229 = vpow2.f32 %v1890_v52  ;;  %v1891_v62 = vmul.f32 -1.442695, %v1179_v39 }
 0x3b2   :  { %v2220_v63 = vpop.eup %2219  ;;  %vm333_vm13 = vcmp.eq.s32.totalorder %v2902_v32, %v313_v37  ;;  %v317_v53 = vadd.s32 64, %v2899_v30  ;;  %vm336_vm2 = vcmp.eq.s32.totalorder %v2902_v32, %v316_v22 }
 0x3b3   :  { %v2222_v35 = vpop.eup %2221  ;;  %v1303_v4 = vadd.f32 %v1287_v61, %v1147_v57  ;;  %v1288_v0 = vmul.f32 %v2220_v63, %v2881_v44  ;;  %2231 = vpow2.f32 %v1891_v62  ;;  %v1362_v5 = vpack.c.bf16 %v1334_v59, %v1333_v56 }
 0x3b4   :  { %v1243_v6 = vadd.f32 1.0, %v2222_v35  ;;  %v311_v62 = vadd.s32 16, %v2899_v30  ;;  %v312_v63 = vadd.s32 24, %v2899_v30  ;;  %vm337_vm3 = vcmp.eq.s32.totalorder %v2902_v32, %v317_v53 }
 0x3b5   :  { %v2224_v9 = vpop.eup %2223  ;;  %v1319_v7 = vmul.f32 %v1303_v4, %v1303_v4  ;;  %v1304_v51 = vadd.f32 %v1288_v0, %v1151_v3  ;;  %2074 = vmatprep.subr.bf16.mxu0 %v1362_v5  ;;  %v318_v0 = vadd.s32 72, %v2899_v30 }
 0x3b6   :  { %2233 = vrcp.f32 %v1243_v6  ;;  %v1244_v36 = vadd.f32 1.0, %v2224_v9  ;;  %2075 = vmatpush3.bf16.msra.mxu0 %v1362_v5  ;;  %vm331_vm11 = vcmp.eq.s32.totalorder %v2902_v32, %v311_v62  ;;  %vm332_vm12 = vcmp.eq.s32.totalorder %v2902_v32, %v312_v63 }
 0x3b7   :  { %v1320_v42 = vmul.f32 %v1304_v51, %v1304_v51  ;;  %v1335_v10 = vsub.f32 %v1319_v7, %v1303_v4  ;;  %vm1894_vm15 = vmpackc.low %vm332_vm12, %vm331_vm11  ;;  %vm338_vm4 = vcmp.eq.s32.totalorder %v2902_v32, %v318_v0  ;;  %v319_v5 = vadd.s32 80, %v2899_v30 }
 0x3b8   :  { %v2226_v8 = vpop.eup %2225  ;;  %2235 = vrcp.f32 %v1244_v36  ;;  %vm1900_vm6 = vmpackc.low %vm338_vm4, %vm337_vm3  ;;  %v320_v6 = vadd.s32 88, %v2899_v30  ;;  %v321_v9 = vadd.s32 96, %v2899_v30  ;;  %v322_v7 = vadd.s32 104, %v2899_v30 }
 0x3b9   :  { %v1336_v14 = vsub.f32 %v1320_v42, %v1304_v51  ;;  %v1289_v44 = vmul.f32 %v2226_v8, %v2875_v41  ;;  %vm339_vm7 = vcmp.eq.s32.totalorder %v2902_v32, %v319_v5  ;;  %v323_v51 = vadd.s32 112, %v2899_v30  ;;  %v1534_v42 = vpop.permute.xlu0 %1533  ;;  %v1539_v8 = vpop.permute.xlu1 %1538 }
 0x3ba   :  { %v2228_v11 = vpop.eup %2227  ;;  %vm340_vm8 = vcmp.eq.s32.totalorder %v2902_v32, %v320_v6  ;;  %vm341_vm9 = vcmp.eq.s32.totalorder %v2902_v32, %v321_v9  ;;  %vm342_vm10 = vcmp.eq.s32.totalorder %v2902_v32, %v322_v7  ;;  %v324_v36 = vadd.s32 120, %v2899_v30 }
 0x3bb   :  { %v2230_v40 = vpop.eup %2229  ;;  %v1305_v13 = vadd.f32 %v1289_v44, %v1157_v55  ;;  %v1290_v16 = vmul.f32 %v2228_v11, %v2879_v43  ;;  %v1363_v17 = vpack.c.bf16 %v1336_v14, %v1335_v10  ;;  %vm1902_vm11 = vmpackc.low %vm340_vm8, %vm339_vm7 }
 0x3bc   :  { %v1245_v18 = vadd.f32 1.0, %v2230_v40  ;;  %vm1904_vm12 = vmpackc.low %vm342_vm10, %vm341_vm9 }
 0x3bd   :  { %v2232_v19 = vpop.eup %2231  ;;  %v1321_v20 = vmul.f32 %v1305_v13, %v1305_v13  ;;  %v1306_v23 = vadd.f32 %v1290_v16, %v1161_v15  ;;  %2076 = vmatprep.subr.bf16.mxu0 %v1363_v17  ;;  %v1544_v10 = vpop.permute.xlu0 %1543 }
 0x3be   :  { %2237 = vrcp.f32 %v1245_v18  ;;  %v1246_v25 = vadd.f32 1.0, %v2232_v19  ;;  %2077 = vmatpush3.bf16.msra.mxu0 %v1363_v17  ;;  %v1549_v14 = vpop.permute.xlu1 %1548 }
 0x3bf   :  { %v1322_v34 = vmul.f32 %v1306_v23, %v1306_v23  ;;  %v1337_v41 = vsub.f32 %v1321_v20, %v1305_v13 }
 0x3c0   :  { %v2234_v26 = vpop.eup %2233  ;;  %2239 = vrcp.f32 %v1246_v25 }
 0x3c1   :  { %v1338_v60 = vsub.f32 %v1322_v34, %v1306_v23  ;;  %v1291_v49 = vmul.f32 %v2234_v26, %v2885_v46  ;;  %v1554_v55 = vpop.permute.xlu0 %1553 }
 0x3c2   :  { %v2236_v43 = vpop.eup %2235 }
 0x3c3   :  { %v1307_v28 = vadd.f32 %v1291_v49, %v1167_v27  ;;  %v1292_v33 = vmul.f32 %v2236_v43, %v2889_v48  ;;  %v1364_v24 = vpack.c.bf16 %v1338_v60, %v1337_v41 }
 0x3c5   :  { %v1323_v1 = vmul.f32 %v1307_v28, %v1307_v28  ;;  %v1308_v50 = vadd.f32 %v1292_v33, %v1171_v31  ;;  %2078 = vmatprep.subr.bf16.mxu0 %v1364_v24  ;;  %v1564_v17 = vpop.permute.xlu0 %1563 }
 0x3c6   :  { %2079 = vmatpush3.bf16.msra.mxu0 %v1364_v24 }
 0x3c7   :  { %v1324_v21 = vmul.f32 %v1308_v50, %v1308_v50  ;;  %v1339_v29 = vsub.f32 %v1323_v1, %v1307_v28 }
 0x3c8   :  { %v2238_v58 = vpop.eup %2237 }
 0x3c9   :  { %v1340_v52 = vsub.f32 %v1324_v21, %v1308_v50  ;;  %v1293_v46 = vmul.f32 %v2238_v58, %v2883_v45  ;;  %v314_v45 = vadd.s32 40, %v2899_v30  ;;  %v1574_v49 = vpop.permute.xlu0 %1573 }
 0x3ca   :  { %v2240_v39 = vpop.eup %2239 }
 0x3cb   :  { %v1309_v54 = vadd.f32 %v1293_v46, %v1177_v38  ;;  %v1294_v48 = vmul.f32 %v2240_v39, %v2887_v47  ;;  %v1365_v56 = vpack.c.bf16 %v1340_v52, %v1339_v29  ;;  %vm334_vm14 = vcmp.eq.s32.totalorder %v2902_v32, %v314_v45 }
 0x3cc   :  { %vm1896_vm0 = vmpackc.low %vm334_vm14, %vm333_vm13  ;;  %v315_v47 = vadd.s32 48, %v2899_v30  ;;  %vm343_vm13 = vcmp.eq.s32.totalorder %v2902_v32, %v323_v51  ;;  %vm344_vm14 = vcmp.eq.s32.totalorder %v2902_v32, %v324_v36  ;;  %v1559_v30 = vpop.permute.xlu1 %1558 }
 0x3cd   :  { %v1325_v57 = vmul.f32 %v1309_v54, %v1309_v54  ;;  %v1310_v59 = vadd.f32 %v1294_v48, %v1181_v12  ;;  %2080 = vmatprep.subr.bf16.mxu0 %v1365_v56  ;;  %v1584_v29 = vpop.permute.xlu0 %1583 }
 0x3ce   :  { %2081 = vmatpush3.bf16.msra.mxu0 %v1365_v56  ;;  %vm335_vm1 = vcmp.eq.s32.totalorder %v2902_v32, %v315_v47 }
 0x3cf   :  { %v1326_v61 = vmul.f32 %v1310_v59, %v1310_v59  ;;  %v1341_v3 = vsub.f32 %v1325_v57, %v1309_v54  ;;  %vm1898_vm5 = vmpackc.low %vm336_vm2, %vm335_vm1 }
 0x3d0   :  { %v1569_v41 = vpop.permute.xlu1 %1568 }
 0x3d1   :  { %v1342_v35 = vsub.f32 %v1326_v61, %v1310_v59  ;;  %v1594_v0 = vpop.permute.xlu0 %1593 }
 0x3d3   :  { %v1366_v4 = vpack.c.bf16 %v1342_v35, %v1341_v3 }
 0x3d4   :  { %v3045_v33 = vpop.permute.xlu1 %1578 }
 0x3d5   :  { %2082 = vmatprep.subr.bf16.mxu0 %v1366_v4 }
 0x3d6   :  { %2083 = vmatpush3.bf16.msra.mxu0 %v1366_v4 }
 0x3d8   :  { %v1589_v3 = vpop.permute.xlu1 %1588 }
 0x3d9   :  { %2085 = vmatmul.mubr.msk.bf16.vlgmr.msra.gmra.mrb[32].mxu0 %vm1894_vm15, %v2567_v2  ;;  %vm1906_vm15 = vmpackc.low %vm344_vm14, %vm343_vm13 }
 0x3da   :  { %2088 = vmatprep.mubr.msk.bf16.mxu0 %vm1896_vm0, %v2567_v2 }
 0x3e1   :  { %2089 = vmatmul.mubr.msk.bf16.gmra.mrb[36].mxu0 %vm1898_vm5, %v2567_v2 }
 0x3e2   :  { %2092 = vmatprep.mubr.msk.bf16.mxu0 %vm1900_vm6, %v2567_v2 }
 0x3e9   :  { %2093 = vmatmul.mubr.msk.bf16.gmra.mrb[40].mxu0 %vm1902_vm11, %v2567_v2 }
 0x3ea   :  { %2096 = vmatprep.mubr.msk.bf16.mxu0 %vm1904_vm12, %v2567_v2 }
 0x3f1   :  { %2097 = vmatmul.mubr.msk.bf16.gmra.mrb[44].mxu0 %vm1906_vm15, %v2567_v2 }
 0x4ac   :  { %v2086_v44 = vpop.f32.mrb[32].mxu0 }
 0x4ad   :  { %v1401_v11 = vpop.f32.mrb[33].mxu0  ;;  %v1613_v13 = vmul.f32 %v2086_v44, %v1544_v10 }
 0x4ae   :  { %v2087_v40 = vpop.f32.mrb[34].mxu0  ;;  %v1611_v16 = vmul.f32 %v1534_v42, %v1401_v11 }
 0x4af   :  { %v1404_v15 = vpop.f32.mrb[35].mxu0  ;;  %v1629_v18 = vmax.f32 %v1613_v13, 0.0  ;;  %v1614_v19 = vmul.f32 %v2087_v40, %v1549_v14 }
 0x4b0   :  { %v1627_v20 = vmax.f32 %v1611_v16, 0.0  ;;  %v1612_v32 = vmul.f32 %v1539_v8, %v1404_v15 }
 0x4b1   :  { %v1645_v23 = vadd.f32 1e-05, %v1629_v18  ;;  %v1630_v25 = vmax.f32 %v1614_v19, 0.0 }
 0x4b2   :  { %v1643_v2 = vadd.f32 1e-05, %v1627_v20  ;;  %v1628_v34 = vmax.f32 %v1612_v32, 0.0  ;;  %v1604_v32 = vpop.permute.xlu0 %1603 }
 0x4b3   :  { %2241 = vrsqrt.f32 %v1645_v23  ;;  %v3039_v43 = vadd.f32 1e-05, %v1630_v25  ;;  %vm1675_vm0 = vcmp.eq.f32.partialorder %v1645_v23, inf  ;;  %vm1677_vm1 = vcmp.eq.f32.partialorder %v1645_v23, 0.0 }
 0x4b4   :  { %v2090_v26 = vpop.f32.mrb[36].mxu0  ;;  %2243 = vrsqrt.f32 %v1643_v2  ;;  %v3041_v28 = vadd.f32 1e-05, %v1628_v34  ;;  %v1678_v12 = vand.u32 2147483648, %v1645_v23  ;;  %vm1661_vm2 = vcmp.eq.f32.partialorder %v1643_v2, inf }
 0x4b5   :  { %v1417_v60 = vpop.f32.mrb[37].mxu0  ;;  %2245 = vrsqrt.f32 %v3039_v43  ;;  %v1617_v24 = vmul.f32 %v2090_v26, %v1564_v17  ;;  %vm1663_vm3 = vcmp.eq.f32.partialorder %v1643_v2, 0.0  ;;  %v1664_v63 = vand.u32 2147483648, %v1643_v2 }
 0x4b6   :  { %v2091_v27 = vpop.f32.mrb[38].mxu0  ;;  %2247 = vrsqrt.f32 %v3041_v28  ;;  %v1615_v1 = vmul.f32 %v1554_v55, %v1417_v60  ;;  %vm1682_vm4 = vcmp.eq.f32.partialorder %v3039_v43, inf  ;;  %vm1684_vm5 = vcmp.eq.f32.partialorder %v3039_v43, 0.0 }
 0x4b7   :  { %v1420_v31 = vpop.f32.mrb[39].mxu0  ;;  %v1618_v50 = vmul.f32 %v2091_v27, %v1569_v41  ;;  %v1633_v52 = vmax.f32 %v1617_v24, 0.0  ;;  %v1685_v22 = vand.u32 2147483648, %v3039_v43  ;;  %vm1668_vm6 = vcmp.eq.f32.partialorder %v3041_v28, inf }
 0x4b8   :  { %v1616_v21 = vmul.f32 %v1559_v30, %v1420_v31  ;;  %v1631_v38 = vmax.f32 %v1615_v1, 0.0  ;;  %vm1670_vm7 = vcmp.eq.f32.partialorder %v3041_v28, 0.0  ;;  %v1671_v14 = vand.u32 2147483648, %v3041_v28  ;;  %v3077_v30 = vpop.permute.xlu1 %1598 }
 0x4b9   :  { %v1634_v46 = vmax.f32 %v1618_v50, 0.0  ;;  %v3047_v57 = vadd.f32 1e-05, %v1633_v52 }
 0x4ba   :  { %v1632_v39 = vmax.f32 %v1616_v21, 0.0  ;;  %v3049_v59 = vadd.f32 1e-05, %v1631_v38 }
 0x4bb   :  { %v3052_v37 = vadd.f32 1e-05, %v1634_v46  ;;  %2249 = vrsqrt.f32 %v3047_v57  ;;  %vm1703_vm8 = vcmp.eq.f32.partialorder %v3047_v57, inf  ;;  %vm1705_vm9 = vcmp.eq.f32.partialorder %v3047_v57, 0.0 }
 0x4bc   :  { %v2094_v58 = vpop.f32.mrb[40].mxu0  ;;  %v3056_v4 = vadd.f32 1e-05, %v1632_v39  ;;  %2251 = vrsqrt.f32 %v3049_v59  ;;  %v1706_v11 = vand.u32 2147483648, %v3047_v57  ;;  %vm1689_vm10 = vcmp.eq.f32.partialorder %v3049_v59, inf }
 0x4bd   :  { %v1433_v54 = vpop.f32.mrb[41].mxu0  ;;  %v2242_v56 = vpop.eup %2241  ;;  %v1621_v9 = vmul.f32 %v2094_v58, %v1584_v29  ;;  %2253 = vrsqrt.f32 %v3052_v37  ;;  %vm1691_vm11 = vcmp.eq.f32.partialorder %v3049_v59, 0.0  ;;  %v1692_v60 = vand.u32 2147483648, %v3049_v59 }
 0x4be   :  { %v2095_v48 = vpop.f32.mrb[42].mxu0  ;;  %v2244_v61 = vpop.eup %2243  ;;  %v1674_v62 = vmul.f32 %v2242_v56, %v1645_v23  ;;  %v1619_v7 = vmul.f32 %v1574_v49, %v1433_v54  ;;  %2255 = vrsqrt.f32 %v3056_v4  ;;  %vm1710_vm12 = vcmp.eq.f32.partialorder %v3052_v37, inf }
 0x4bf   :  { %v1436_v45 = vpop.f32.mrb[43].mxu0  ;;  %v1660_v35 = vmul.f32 %v2244_v61, %v1643_v2  ;;  %v2246_v53 = vpop.eup %2245  ;;  %v1637_v16 = vmax.f32 %v1621_v9, 0.0  ;;  %v1622_v20 = vmul.f32 %v2095_v48, %v1589_v3  ;;  %vm1712_vm13 = vcmp.eq.f32.partialorder %v3052_v37, 0.0 }
 0x4c0   :  { %v1676_v47 = vsel %vm1675_vm0, %v1645_v23, %v1674_v62  ;;  %v2248_v51 = vpop.eup %2247  ;;  %v1681_v42 = vmul.f32 %v2246_v53, %v3039_v43  ;;  %v1635_v17 = vmax.f32 %v1619_v7, 0.0  ;;  %v1620_v34 = vmul.f32 %v3045_v33, %v1436_v45 }
 0x4c1   :  { %v1679_v5 = vsel %vm1677_vm1, %v1678_v12, %v1676_v47  ;;  %v1662_v6 = vsel %vm1661_vm2, %v1643_v2, %v1660_v35  ;;  %v1667_v10 = vmul.f32 %v2248_v51, %v3041_v28  ;;  %v3087_v23 = vadd.f32 1e-05, %v1637_v16 }
 0x4c2   :  { %1773 = vst [vmem:[#allocation20 + $0x10] sm:$0xff] %v1679_v5  ;;  %v1665_v36 = vsel %vm1663_vm3, %v1664_v63, %v1662_v6  ;;  %v1683_v44 = vsel %vm1682_vm4, %v3039_v43, %v1681_v42  ;;  %v3089_v25 = vadd.f32 1e-05, %v1635_v17  ;;  %v1638_v2 = vmax.f32 %v1622_v20, 0.0 }
 0x4c3   :  { %1771 = vst [vmem:[#allocation20] sm:$0xff] %v1665_v36  ;;  %v1686_v13 = vsel %vm1684_vm5, %v1685_v22, %v1683_v44  ;;  %v1669_v15 = vsel %vm1668_vm6, %v3041_v28, %v1667_v10  ;;  %2257 = vrsqrt.f32 %v3087_v23  ;;  %v1713_v43 = vand.u32 2147483648, %v3052_v37  ;;  %v1609_v28 = vpop.permute.xlu1 %1608 }
 0x4c4   :  { %v2098_v8 = vpop.f32.mrb[44].mxu0  ;;  %1774 = vst [vmem:[#allocation20 + $0x18] sm:$0xff] %v1686_v13  ;;  %v1672_v19 = vsel %vm1670_vm7, %v1671_v14, %v1669_v15  ;;  %2259 = vrsqrt.f32 %v3089_v25  ;;  %vm1696_vm14 = vcmp.eq.f32.partialorder %v3056_v4, inf  ;;  %v1654_v33 = vadd.f32 1e-05, %v1638_v2 }
 0x4c5   :  { %v1449_v55 = vpop.f32.mrb[45].mxu0  ;;  %1772 = vst [vmem:[#allocation20 + $0x8] sm:$0xff] %v1672_v19  ;;  %v1625_v26 = vmul.f32 %v2098_v8, %v1604_v32  ;;  %v2250_v41 = vpop.eup %2249  ;;  %v1636_v24 = vmax.f32 %v1620_v34, 0.0  ;;  %vm1698_vm15 = vcmp.eq.f32.partialorder %v3056_v4, 0.0  ;;  %v1699_v48 = vand.u32 2147483648, %v3056_v4 }
 0x4c6   :  { %v2099_v40 = vpop.f32.mrb[46].mxu0  ;;  %v2252_v27 = vpop.eup %2251  ;;  %v1702_v49 = vmul.f32 %v2250_v41, %v3047_v57  ;;  %v1623_v58 = vmul.f32 %v1594_v0, %v1449_v55  ;;  %2261 = vrsqrt.f32 %v1654_v33  ;;  %vm1731_vm0 = vcmp.eq.f32.partialorder %v3087_v23, inf }
 0x4c7   :  { %v1452_v18 = vpop.f32.mrb[47].mxu0  ;;  %v1688_v31 = vmul.f32 %v2252_v27, %v3049_v59  ;;  %v2254_v1 = vpop.eup %2253  ;;  %v1641_v21 = vmax.f32 %v1625_v26, 0.0  ;;  %v1626_v29 = vmul.f32 %v2099_v40, %v1609_v28  ;;  %vm1733_vm1 = vcmp.eq.f32.partialorder %v3087_v23, 0.0 }
 0x4c8   :  { %v1704_v50 = vsel %vm1703_vm8, %v3047_v57, %v1702_v49  ;;  %v2256_v52 = vpop.eup %2255  ;;  %v1709_v39 = vmul.f32 %v2254_v1, %v3052_v37  ;;  %v1652_v57 = vadd.f32 1e-05, %v1636_v24  ;;  %v1639_v63 = vmax.f32 %v1623_v58, 0.0 }
 0x4c9   :  { %v1707_v38 = vsel %vm1705_vm9, %v1706_v11, %v1704_v50  ;;  %v1690_v46 = vsel %vm1689_vm10, %v3049_v59, %v1688_v31  ;;  %v1695_v12 = vmul.f32 %v2256_v52, %v3056_v4  ;;  %v1657_v61 = vadd.f32 1e-05, %v1641_v21 }
 0x4ca   :  { %1777 = vst [vmem:[#allocation20 + $0x30] sm:$0xff] %v1707_v38  ;;  %v1693_v54 = vsel %vm1691_vm11, %v1692_v60, %v1690_v46  ;;  %v1711_v56 = vsel %vm1710_vm12, %v3052_v37, %v1709_v39  ;;  %v1642_v45 = vmax.f32 %v1626_v29, 0.0  ;;  %2263 = vrsqrt.f32 %v1652_v57 }
 0x4cb   :  { %1775 = vst [vmem:[#allocation20 + $0x20] sm:$0xff] %v1693_v54  ;;  %v1714_v62 = vsel %vm1712_vm13, %v1713_v43, %v1711_v56  ;;  %v1697_v59 = vsel %vm1696_vm14, %v3056_v4, %v1695_v12  ;;  %2265 = vrsqrt.f32 %v1657_v61  ;;  %v1655_v47 = vadd.f32 1e-05, %v1639_v63 }
 0x4cc   :  { %1778 = vst [vmem:[#allocation20 + $0x38] sm:$0xff] %v1714_v62  ;;  %v1700_v3 = vsel %vm1698_vm15, %v1699_v48, %v1697_v59  ;;  %v1658_v22 = vadd.f32 1e-05, %v1642_v45  ;;  %v1624_v37 = vmul.f32 %v3077_v30, %v1452_v18  ;;  %v1734_v4 = vand.u32 2147483648, %v3087_v23 }
 0x4cd   :  { %1776 = vst [vmem:[#allocation20 + $0x28] sm:$0xff] %v1700_v3  ;;  %v2258_v35 = vpop.eup %2257  ;;  %2267 = vrsqrt.f32 %v1655_v47  ;;  %vm1717_vm2 = vcmp.eq.f32.partialorder %v3089_v25, inf  ;;  %v1720_v9 = vand.u32 2147483648, %v3089_v25  ;;  %vm1719_vm3 = vcmp.eq.f32.partialorder %v3089_v25, 0.0 }
 0x4ce   :  { %v2260_v53 = vpop.eup %2259  ;;  %v1730_v0 = vmul.f32 %v2258_v35, %v3087_v23  ;;  %2269 = vrsqrt.f32 %v1658_v22  ;;  %v1640_v10 = vmax.f32 %v1624_v37, 0.0  ;;  %vm1738_vm4 = vcmp.eq.f32.partialorder %v1654_v33, inf }
 0x4cf   :  { %v1716_v5 = vmul.f32 %v2260_v53, %v3089_v25  ;;  %v1741_v14 = vand.u32 2147483648, %v1654_v33  ;;  %vm1740_vm5 = vcmp.eq.f32.partialorder %v1654_v33, 0.0  ;;  %vm1724_vm6 = vcmp.eq.f32.partialorder %v1652_v57, inf }
 0x4d0   :  { %v1732_v6 = vsel %vm1731_vm0, %v3087_v23, %v1730_v0  ;;  %v2262_v7 = vpop.eup %2261  ;;  %v1656_v44 = vadd.f32 1e-05, %v1640_v10  ;;  %v1727_v15 = vand.u32 2147483648, %v1652_v57  ;;  %vm1726_vm7 = vcmp.eq.f32.partialorder %v1652_v57, 0.0 }
 0x4d1   :  { %v1735_v51 = vsel %vm1733_vm1, %v1734_v4, %v1732_v6  ;;  %v1718_v36 = vsel %vm1717_vm2, %v3089_v25, %v1716_v5  ;;  %v1737_v8 = vmul.f32 %v2262_v7, %v1654_v33  ;;  %vm1759_vm8 = vcmp.eq.f32.partialorder %v1657_v61, inf }
 0x4d2   :  { %1781 = vst [vmem:[#allocation20 + $0x50] sm:$0xff] %v1735_v51  ;;  %v1721_v42 = vsel %vm1719_vm3, %v1720_v9, %v1718_v36  ;;  %2271 = vrsqrt.f32 %v1656_v44  ;;  %v1762_v18 = vand.u32 2147483648, %v1657_v61  ;;  %vm1761_vm9 = vcmp.eq.f32.partialorder %v1657_v61, 0.0 }
 0x4d3   :  { %1779 = vst [vmem:[#allocation20 + $0x40] sm:$0xff] %v1721_v42  ;;  %v1739_v55 = vsel %vm1738_vm4, %v1654_v33, %v1737_v8  ;;  %vm1745_vm10 = vcmp.eq.f32.partialorder %v1655_v47, inf  ;;  %v1748_v34 = vand.u32 2147483648, %v1655_v47  ;;  %vm1747_vm11 = vcmp.eq.f32.partialorder %v1655_v47, 0.0 }
 0x4d4   :  { %v2264_v11 = vpop.eup %2263  ;;  %v1742_v40 = vsel %vm1740_vm5, %v1741_v14, %v1739_v55  ;;  %vm1766_vm12 = vcmp.eq.f32.partialorder %v1658_v22, inf  ;;  %v1769_v60 = vand.u32 2147483648, %v1658_v22  ;;  %vm1768_vm13 = vcmp.eq.f32.partialorder %v1658_v22, 0.0 }
 0x4d5   :  { %v2266_v30 = vpop.eup %2265  ;;  %1782 = vst [vmem:[#allocation20 + $0x58] sm:$0xff] %v1742_v40  ;;  %v1723_v13 = vmul.f32 %v2264_v11, %v1652_v57  ;;  %vm1752_vm14 = vcmp.eq.f32.partialorder %v1656_v44, inf  ;;  %v1755_v33 = vand.u32 2147483648, %v1656_v44  ;;  %vm1754_vm15 = vcmp.eq.f32.partialorder %v1656_v44, 0.0 }
 0x4d6   :  { %v1758_v16 = vmul.f32 %v2266_v30, %v1657_v61 }
 0x4d7   :  { %v1725_v17 = vsel %vm1724_vm6, %v1652_v57, %v1723_v13  ;;  %v2268_v19 = vpop.eup %2267 }
 0x4d8   :  { %v1728_v20 = vsel %vm1726_vm7, %v1727_v15, %v1725_v17  ;;  %v1760_v32 = vsel %vm1759_vm8, %v1657_v61, %v1758_v16  ;;  %v2270_v23 = vpop.eup %2269  ;;  %v1744_v2 = vmul.f32 %v2268_v19, %v1655_v47 }
 0x4d9   :  { %1780 = vst [vmem:[#allocation20 + $0x48] sm:$0xff] %v1728_v20  ;;  %v1763_v25 = vsel %vm1761_vm9, %v1762_v18, %v1760_v32  ;;  %v1765_v26 = vmul.f32 %v2270_v23, %v1658_v22 }
 0x4da   :  { %1785 = vst [vmem:[#allocation20 + $0x70] sm:$0xff] %v1763_v25  ;;  %v1746_v41 = vsel %vm1745_vm10, %v1655_v47, %v1744_v2 }
 0x4db   :  { %v1749_v27 = vsel %vm1747_vm11, %v1748_v34, %v1746_v41  ;;  %v1767_v49 = vsel %vm1766_vm12, %v1658_v22, %v1765_v26 }
 0x4dc   :  { %1783 = vst [vmem:[#allocation20 + $0x60] sm:$0xff] %v1749_v27  ;;  %v1770_v43 = vsel %vm1768_vm13, %v1769_v60, %v1767_v49  ;;  %v2272_v28 = vpop.eup %2271 }
 0x4dd   :  { %1786 = vst [vmem:[#allocation20 + $0x78] sm:$0xff] %v1770_v43  ;;  %v1751_v31 = vmul.f32 %v2272_v28, %v1656_v44 }
 0x4df   :  { %v1753_v24 = vsel %vm1752_vm14, %v1656_v44, %v1751_v31 }
 0x4e0   :  { %v1756_v1 = vsel %vm1754_vm15, %v1755_v33, %v1753_v24 }
 0x4e1   :  { %1784 = vst [vmem:[#allocation20 + $0x68] sm:$0xff] %v1756_v1 }
 0x4e2   :  { %2526 = shalt.err (!%p2523_p8)
}
 0x4e3   :  { %s2527_s16 = scalar_lea.hbm %s3161_s11, 2048 }
 0x4e4   :  { %p2528_p9 = scmp.ne.s32.totalorder %s3161_s11, %s2527_s16  ;;  %p2531_p10 = scmp.lt.u32.totalorder %s2527_s16, %s3161_s11 }
 0x4e6   :  { %p2533_p11 = pnand %p2531_p10, %p2528_p9 }
 0x4e8   :  { %2536 = shalt.err (!%p2533_p11)
}
 0x4e9   :  { %1798 = dma.vmem_to_hbm [thread:$0]  %s1793_s4, 2048, %s3161_s11, [#allocation4], %s2559_s28, %s2559_s28, %s2560_s1  }
 0x4ea   :  { %2549 = dma.done.wait [#allocation4], 2048  }
 0x4eb   :  { %2550 = vsyncadd [#allocation4], 4294965248 }
 0x4ec   :  { %1802 = vsyncpa [#allocation3], 1 }
 0x4ed   :  { %1803 = vsyncpa [#allocation6], 1 }
 0x4ee   :  { %1804 = vsyncpa [#allocation9], 1 }
 0x4ef   :  { %1805 = vsyncpa [#allocation12], 1 }
 0x4f0   :  { %1806 = vsyncpa [#allocation15], 1 }
 0x4f1   :  { %1807 = vsyncpa [#allocation18], 1 }
 0x4f2   :  { %1808 = vsyncpa [#allocation4], 1 }

</bundles_post_ra>
